<compile_context>
chip_gen: v7x
topology: tpu7x:2x2x1
jax: 0.10.0
libtpu: 0.0.40
codegen_flags: <defaults>
</compile_context>

<pallas_src>
import functools

import jax
import jax.numpy as jnp
import numpy as np
from jax.experimental import pallas as pl
from jax.experimental.pallas import tpu as pltpu

DIST_RANGE = 5.0        # self.dist_range in the PyTorch module
LEAKY_SLOPE = 0.01      # nn.LeakyReLU default negative_slope


def _leaky(x):
    # max(x, 0.01*x) == LeakyReLU(x) for slope in (0, 1): 2 VALU ops instead of 3.
    return jnp.maximum(x, LEAKY_SLOPE * x)


def _round_up(v, m):
    return ((v + m - 1) // m) * m


def _v2p_kernel(x_ref, w1_ref, woff_ref, wconv_ref, wsq_ref, b_ref, out_ref,
                *, k, mp, outp):
    """One batch tile of the V2PFinetuner_v4 forward.

    x_ref    : (TB, k*C) bf16 — row-major concat of the k tokens of each batch element
    w1_ref   : (k*C, k*MP + OUTP) bf16 — block-diagonal W_in blocks + pre-residual selection
    woff_ref : (k*C, k*MP) bf16 — block-diagonal (bias-free) offset-MLP weight
    wconv_ref: (k*MP, MP) bf16 — Conv1d(M, M, k) rewritten as one fused contraction
    wsq_ref  : (MP, 2*MP + OUTP) bf16 — [W_tune | W_o1 | W_o2] concatenated along lanes
    b_ref    : (3, MP) f32 — [b_in; b_conv; b_o1]
    out_ref  : (TB, OUTP) f32 — lane-dense padded output
    """
    xb = x_ref[...]                                              # (TB, KC) bf16
    # offset weight clip: only offset rows of woff are nonzero, so clipping the whole row is safe.
    xc = jnp.maximum(1.0 - xb.astype(jnp.float32) * (1.0 / DIST_RANGE),
                     0.0).astype(jnp.bfloat16)                   # (TB, KC) bf16

    b_in = b_ref[0:1, :]                                         # (1, MP) f32
    b_conv = b_ref[1:2, :]
    b_o1 = b_ref[2:3, :]

    # ---- stage 1: unrolled k-loop over 128-lane-aligned slices (small live intermediates) ----
    conv_acc = None
    t_in_0 = None
    for s in range(k):                                           # static, unrolled at trace time
        lo = s * mp
        t_in_s = _leaky(jnp.dot(xb, w1_ref[:, lo:lo + mp],
                                preferred_element_type=jnp.float32) + b_in)   # (TB, MP) f32
        ow_s = jnp.tanh(jnp.dot(xc, woff_ref[:, lo:lo + mp],
                                preferred_element_type=jnp.float32))          # (TB, MP) f32
        prod_s = (t_in_s * ow_s).astype(jnp.bfloat16)
        part = jnp.dot(prod_s, wconv_ref[lo:lo + mp, :],
                       preferred_element_type=jnp.float32)                    # (TB, MP) f32
        conv_acc = part if conv_acc is None else conv_acc + part
        if s == 0:
            t_in_0 = t_in_s                                      # kept for the mlp_tune residual

    # pre[:, 0, :] residual, fused as the last 128-lane block of the stage-1 weight.
    pre = jnp.dot(xb, w1_ref[:, k * mp:k * mp + outp],
                  preferred_element_type=jnp.float32)            # (TB, OUTP) f32

    # ---- stage 2: conv-activation -> tune (+ residual) -> mlp_out ----
    conv = _leaky(conv_acc + b_conv)                             # (TB, MP)
    tmp = (jnp.dot(conv.astype(jnp.bfloat16), wsq_ref[:, :mp],
                   preferred_element_type=jnp.float32) + t_in_0)
    h = _leaky(jnp.dot(tmp.astype(jnp.bfloat16), wsq_ref[:, mp:2 * mp],
                       preferred_element_type=jnp.float32) + b_o1)
    out = (jnp.dot(h.astype(jnp.bfloat16), wsq_ref[:, 2 * mp:2 * mp + outp],
                   preferred_element_type=jnp.float32) + pre)
    out_ref[...] = out.astype(out_ref.dtype)


def v2p_finetuner_v4_forward(x, d, params, *, pre_channels, f_channels,
                             out_channels, k, main_channel, batch_tile=1024):
    """Pallas implementation of V2PFinetuner_v4.forward(x, d)."""
    del d  # `d` is an argument of the PyTorch forward but is never used in it.
    B, S, C = x.shape
    P, F, M = pre_channels, f_channels, main_channel
    OUT = out_channels
    assert S == k, "the .view(-1, main, k) in the module requires seq len == k"
    assert C == P + F + 3, "offset slice feeds Linear(3, main) -> 3 offset channels"
    assert OUT == P, "final residual add requires out_channels == pre_channels"

    MP = _round_up(M, 128)          # pad main channel -> lane-dense intermediates
    OUTP = _round_up(OUT, 128)      # pad output       -> lane-dense stores
    KC = k * C
    wdt = jnp.bfloat16              # MXU-native operand dtype; accumulation stays f32
    odt = jnp.float32

    # ---------------- weight preparation (bf16, zero-padded / block-diagonal, fused) ----------------
    win_t = params["W_in"].T.astype(jnp.float32)            # (F, M)
    woff_t = params["W_off"].T.astype(jnp.float32)          # (3, M)

    # Stage-1 weight: k block-diagonal W_in blocks + a trailing OUTP-wide pre-selection block.
    W_stage1 = jnp.zeros((KC, k * MP + OUTP), jnp.float32)
    W_off_big = jnp.zeros((KC, k * MP), jnp.float32)
    for s in range(k):                                       # tiny trace-time loop
        W_stage1 = W_stage1.at[s * C + P:s * C + P + F, s * MP:s * MP + M].set(win_t)
        W_off_big = W_off_big.at[s * C + P + F:s * C + C, s * MP:s * MP + M].set(woff_t)
    # pre[:, 0, :P] residual == x2[:, :P]; select it into the first P output lanes.
    W_stage1 = W_stage1.at[jnp.arange(P), k * MP + jnp.arange(P)].set(1.0)

    # Conv1d weight (M, M, k): prod.view(-1, M, k) contraction == prod_flat @ W_conv.reshape(M, M*k).T
    wck = params["W_conv"].astype(jnp.float32).reshape(M, M * k).T.reshape(k, M, M)
    W_conv_big = jnp.zeros((k, MP, MP), jnp.float32).at[:, :M, :M].set(wck).reshape(k * MP, MP)

    # Square weights concatenated along lanes: [W_tune | W_o1 | W_o2(->OUTP)].
    W_sq = jnp.zeros((MP, 2 * MP + OUTP), jnp.float32)
    W_sq = W_sq.at[:M, :M].set(params["W_tune"].T.astype(jnp.float32))
    W_sq = W_sq.at[:M, MP:MP + M].set(params["W_o1"].T.astype(jnp.float32))
    W_sq = W_sq.at[:M, 2 * MP:2 * MP + OUT].set(params["W_o2"].T.astype(jnp.float32))

    # Biases stacked into one tiny f32 operand: [b_in; b_conv; b_o1].
    b_all = jnp.zeros((3, MP), jnp.float32)
    b_all = b_all.at[0, :M].set(params["b_in"].astype(jnp.float32))
    b_all = b_all.at[1, :M].set(params["b_conv"].astype(jnp.float32))
    b_all = b_all.at[2, :M].set(params["b_o1"].astype(jnp.float32))

    W_stage1 = W_stage1.astype(wdt)
    W_off_big = W_off_big.astype(wdt)
    W_conv_big = W_conv_big.astype(wdt)
    W_sq = W_sq.astype(wdt)

    # ---------------- input: a single (B, k*C) lane-dense bf16 stream ----------------
    x2 = x.reshape(B, KC).astype(wdt)                        # contiguous reshape, no shuffle

    # Megacore-safe batch tiling: never produce grid == 1 (except for tiny B), so both
    # v7x TensorCores get work; 16-row alignment keeps the bf16 sublane packing happy.
    half = _round_up(pl.cdiv(B, 2), 16)
    TB = int(max(16, min(batch_tile, half)))
    grid_b = pl.cdiv(B, TB)
    Bp = grid_b * TB
    if Bp != B:
        x2 = jnp.pad(x2, ((0, Bp - B), (0, 0)))

    kernel = functools.partial(_v2p_kernel, k=k, mp=MP, outp=OUTP)

    def _w(arr):                                             # full-array (constant-index) weight spec
        n = arr.ndim
        return pl.BlockSpec(arr.shape, lambda i, _n=n: (0,) * _n)

    # Advisory cost estimate only.  Activations scale with Bp, weights are counted once total,
    # and transcendentals include the padded lanes -- intentionally approximate, do not "fix".
    per_row_mm = (KC * (k * MP + OUTP) + KC * k * MP + k * MP * MP
                  + 2 * MP * MP + MP * OUTP)
    flops = 2 * Bp * per_row_mm
    weight_bytes = 2 * (W_stage1.size + W_off_big.size + W_conv_big.size + W_sq.size) \
        + 4 * b_all.size
    bytes_accessed = 2 * Bp * KC + 4 * Bp * OUTP + weight_bytes

    out = pl.pallas_call(
        kernel,
        out_shape=jax.ShapeDtypeStruct((Bp, OUTP), odt),
        grid=(grid_b,),
        in_specs=[
            pl.BlockSpec((TB, KC), lambda i: (i, 0)),            # fused x tokens (bf16)
            _w(W_stage1), _w(W_off_big), _w(W_conv_big), _w(W_sq), _w(b_all),
        ],
        out_specs=pl.BlockSpec((TB, OUTP), lambda i: (i, 0)),    # lane-dense output block
        compiler_params=pltpu.CompilerParams(
            dimension_semantics=("parallel",),
            vmem_limit_bytes=48 * 1024 * 1024),                  # <= v7x 64 MiB, ample on v5e/v6e
        cost_estimate=pl.CostEstimate(flops=flops,
                                      transcendentals=Bp * k * MP,
                                      bytes_accessed=bytes_accessed),
    )(x2, W_stage1, W_off_big, W_conv_big, W_sq, b_all)

    return out[:B, :OUT]


def reference_forward(x, p, P, F, K, M):
    """Pure-JAX f32 mirror of the PyTorch forward (for verification)."""
    def leaky(v):
        return jnp.where(v >= 0, v, LEAKY_SLOPE * v)
    pre = x[:, :, :P]
    feature = x[:, :, P:P + F]
    offset = x[:, :, P + F:]
    offset_w = jnp.maximum(1.0 - offset / DIST_RANGE, 0.0)
    tmp_in = leaky(jnp.einsum("bsf,mf->bsm", feature, p["W_in"]) + p["b_in"])
    ow = jnp.tanh(jnp.einsum("bsc,mc->bsm", offset_w, p["W_off"]))
    prod = (tmp_in * ow).reshape(-1, M, K)          # same memory reinterpretation as .view
    conv = leaky(jnp.einsum("omk,bmk->bo", p["W_conv"], prod) + p["b_conv"])
    tuned = conv @ p["W_tune"].T
    tmp = tuned + tmp_in[:, 0, :]
    h = leaky(tmp @ p["W_o1"].T + p["b_o1"])
    return h @ p["W_o2"].T + pre[:, 0, :]


if __name__ == "__main__":
    # Shapes consistent with the module: seq == k, 3 offset channels,
    # out_channels == pre_channels (required by the final residual add).
    P, F, OUT, K, M = 4, 8, 4, 4, 96
    B = 256            # default batch_tile -> TB=128 -> grid of 2 (both TCs busy on v7x)

    key = jax.random.PRNGKey(0)
    ks = jax.random.split(key, 11)
    params = {
        "W_off":  0.2 * jax.random.normal(ks[0], (M, 3), jnp.float32),
        "W_in":   0.2 * jax.random.normal(ks[1], (M, F), jnp.float32),
        "b_in":   0.1 * jax.random.normal(ks[2], (M,), jnp.float32),
        "W_conv": 0.1 * jax.random.normal(ks[3], (M, M, K), jnp.float32),
        "b_conv": 0.1 * jax.random.normal(ks[4], (M,), jnp.float32),
        "W_tune": 0.1 * jax.random.normal(ks[5], (M, M), jnp.float32),
        "W_o1":   0.1 * jax.random.normal(ks[6], (M, M), jnp.float32),
        "b_o1":   0.1 * jax.random.normal(ks[7], (M,), jnp.float32),
        "W_o2":   0.1 * jax.random.normal(ks[8], (OUT, M), jnp.float32),
    }

    x = jax.random.normal(ks[9], (B, K, P + F + 3), jnp.float32)
    d = jax.random.normal(ks[10], (B, K, 3), jnp.float32)   # unused by forward()

    out = v2p_finetuner_v4_forward(
        x, d, params, pre_channels=P, f_channels=F, out_channels=OUT,
        k=K, main_channel=M)
    out = jax.block_until_ready(out)

    ref = reference_forward(x, params, P, F, K, M)
    # bf16 matmul operands (f32 accumulation) -> relaxed tolerance vs. the f32 reference.
    np.testing.assert_allclose(np.asarray(out), np.asarray(ref),
                               rtol=5e-2, atol=5e-2)
    print("KERNEL_OK")
</pallas_src>

<mosaic_0001>
module attributes {stable_mosaic.version = 11 : i64} {
  func.func @_v2p_kernel(%arg0: i32, %arg1: memref<128x60xbf16, #tpu.memory_space<vmem>>, %arg2: memref<60x640xbf16, #tpu.memory_space<vmem>>, %arg3: memref<60x512xbf16, #tpu.memory_space<vmem>>, %arg4: memref<512x128xbf16, #tpu.memory_space<vmem>>, %arg5: memref<128x384xbf16, #tpu.memory_space<vmem>>, %arg6: memref<3x128xf32, #tpu.memory_space<vmem>>, %arg7: memref<128x128xf32, #tpu.memory_space<vmem>>) attributes {dimension_semantics = [#tpu.dimension_semantics<parallel>], iteration_bounds = array<i64: 2>, scalar_prefetch = 0 : i64, scratch_operands = 0 : i64, tpu.core_type = #tpu.core_type<tc>, window_params = [{transform_indices = @transform_0, window_bounds = array<i64: 128, 60>}, {pipeline_mode = #tpu.pipeline_mode<synchronous>, transform_indices = @transform_1, window_bounds = array<i64: 60, 640>}, {pipeline_mode = #tpu.pipeline_mode<synchronous>, transform_indices = @transform_2, window_bounds = array<i64: 60, 512>}, {pipeline_mode = #tpu.pipeline_mode<synchronous>, transform_indices = @transform_3, window_bounds = array<i64: 512, 128>}, {pipeline_mode = #tpu.pipeline_mode<synchronous>, transform_indices = @transform_4, window_bounds = array<i64: 128, 384>}, {pipeline_mode = #tpu.pipeline_mode<synchronous>, transform_indices = @transform_5, window_bounds = array<i64: 3, 128>}, {transform_indices = @transform_6, window_bounds = array<i64: 128, 128>}]} {
    %c0 = arith.constant 0 : index
    %c0_0 = arith.constant 0 : index
    %0 = vector.load %arg1[%c0, %c0_0] : memref<128x60xbf16, #tpu.memory_space<vmem>>, vector<128x60xbf16>
    %1 = arith.extf %0 : vector<128x60xbf16> to vector<128x60xf32>
    %cst = arith.constant 2.000000e-01 : f32
    %2 = vector.broadcast %cst : f32 to vector<128x60xf32>
    %3 = arith.mulf %1, %2 : vector<128x60xf32>
    %cst_1 = arith.constant 1.000000e+00 : f32
    %4 = vector.broadcast %cst_1 : f32 to vector<128x60xf32>
    %5 = arith.subf %4, %3 : vector<128x60xf32>
    %cst_2 = arith.constant 0.000000e+00 : f32
    %6 = vector.broadcast %cst_2 : f32 to vector<128x60xf32>
    %7 = arith.maximumf %5, %6 : vector<128x60xf32>
    %8 = arith.truncf %7 : vector<128x60xf32> to vector<128x60xbf16>
    %c0_3 = arith.constant 0 : index
    %c0_4 = arith.constant 0 : index
    %9 = vector.load %arg6[%c0_3, %c0_4] : memref<3x128xf32, #tpu.memory_space<vmem>>, vector<1x128xf32>
    %c1 = arith.constant 1 : index
    %c0_5 = arith.constant 0 : index
    %10 = vector.load %arg6[%c1, %c0_5] : memref<3x128xf32, #tpu.memory_space<vmem>>, vector<1x128xf32>
    %c2 = arith.constant 2 : index
    %c0_6 = arith.constant 0 : index
    %11 = vector.load %arg6[%c2, %c0_6] : memref<3x128xf32, #tpu.memory_space<vmem>>, vector<1x128xf32>
    %c0_7 = arith.constant 0 : index
    %c0_8 = arith.constant 0 : index
    %12 = vector.load %arg2[%c0_7, %c0_8] : memref<60x640xbf16, #tpu.memory_space<vmem>>, vector<60x128xbf16>
    %cst_9 = arith.constant dense<0.000000e+00> : vector<128x128xf32>
    %13 = tpu.matmul %0, %12, %cst_9 {dimension_numbers = #tpu.dot_dimension_numbers<[1], [0], [0], [1], [0, 0, 1, 1], [], []>} : vector<128x60xbf16>, vector<60x128xbf16>, vector<128x128xf32> -> vector<128x128xf32>
    %14 = vector.broadcast %9 : vector<1x128xf32> to vector<128x128xf32>
    %15 = arith.addf %13, %14 : vector<128x128xf32>
    %cst_10 = arith.constant 0.00999999977 : f32
    %16 = vector.broadcast %cst_10 : f32 to vector<128x128xf32>
    %17 = arith.mulf %16, %15 : vector<128x128xf32>
    %18 = arith.maximumf %15, %17 : vector<128x128xf32>
    %c0_11 = arith.constant 0 : index
    %c0_12 = arith.constant 0 : index
    %19 = vector.load %arg3[%c0_11, %c0_12] : memref<60x512xbf16, #tpu.memory_space<vmem>>, vector<60x128xbf16>
    %cst_13 = arith.constant dense<0.000000e+00> : vector<128x128xf32>
    %20 = tpu.matmul %8, %19, %cst_13 {dimension_numbers = #tpu.dot_dimension_numbers<[1], [0], [0], [1], [0, 0, 1, 1], [], []>} : vector<128x60xbf16>, vector<60x128xbf16>, vector<128x128xf32> -> vector<128x128xf32>
    %21 = math.tanh %20 : vector<128x128xf32>
    %22 = arith.mulf %18, %21 : vector<128x128xf32>
    %23 = arith.truncf %22 : vector<128x128xf32> to vector<128x128xbf16>
    %c0_14 = arith.constant 0 : index
    %c0_15 = arith.constant 0 : index
    %24 = vector.load %arg4[%c0_14, %c0_15] : memref<512x128xbf16, #tpu.memory_space<vmem>>, vector<128x128xbf16>
    %cst_16 = arith.constant dense<0.000000e+00> : vector<128x128xf32>
    %25 = tpu.matmul %23, %24, %cst_16 {dimension_numbers = #tpu.dot_dimension_numbers<[1], [0], [0], [1], [0, 0, 1, 1], [], []>} : vector<128x128xbf16>, vector<128x128xbf16>, vector<128x128xf32> -> vector<128x128xf32>
    %c0_17 = arith.constant 0 : index
    %c128 = arith.constant 128 : index
    %26 = vector.load %arg2[%c0_17, %c128] : memref<60x640xbf16, #tpu.memory_space<vmem>>, vector<60x128xbf16>
    %cst_18 = arith.constant dense<0.000000e+00> : vector<128x128xf32>
    %27 = tpu.matmul %0, %26, %cst_18 {dimension_numbers = #tpu.dot_dimension_numbers<[1], [0], [0], [1], [0, 0, 1, 1], [], []>} : vector<128x60xbf16>, vector<60x128xbf16>, vector<128x128xf32> -> vector<128x128xf32>
    %28 = vector.broadcast %9 : vector<1x128xf32> to vector<128x128xf32>
    %29 = arith.addf %27, %28 : vector<128x128xf32>
    %cst_19 = arith.constant 0.00999999977 : f32
    %30 = vector.broadcast %cst_19 : f32 to vector<128x128xf32>
    %31 = arith.mulf %30, %29 : vector<128x128xf32>
    %32 = arith.maximumf %29, %31 : vector<128x128xf32>
    %c0_20 = arith.constant 0 : index
    %c128_21 = arith.constant 128 : index
    %33 = vector.load %arg3[%c0_20, %c128_21] : memref<60x512xbf16, #tpu.memory_space<vmem>>, vector<60x128xbf16>
    %cst_22 = arith.constant dense<0.000000e+00> : vector<128x128xf32>
    %34 = tpu.matmul %8, %33, %cst_22 {dimension_numbers = #tpu.dot_dimension_numbers<[1], [0], [0], [1], [0, 0, 1, 1], [], []>} : vector<128x60xbf16>, vector<60x128xbf16>, vector<128x128xf32> -> vector<128x128xf32>
    %35 = math.tanh %34 : vector<128x128xf32>
    %36 = arith.mulf %32, %35 : vector<128x128xf32>
    %37 = arith.truncf %36 : vector<128x128xf32> to vector<128x128xbf16>
    %c128_23 = arith.constant 128 : index
    %c0_24 = arith.constant 0 : index
    %38 = vector.load %arg4[%c128_23, %c0_24] : memref<512x128xbf16, #tpu.memory_space<vmem>>, vector<128x128xbf16>
    %cst_25 = arith.constant dense<0.000000e+00> : vector<128x128xf32>
    %39 = tpu.matmul %37, %38, %cst_25 {dimension_numbers = #tpu.dot_dimension_numbers<[1], [0], [0], [1], [0, 0, 1, 1], [], []>} : vector<128x128xbf16>, vector<128x128xbf16>, vector<128x128xf32> -> vector<128x128xf32>
    %40 = arith.addf %25, %39 : vector<128x128xf32>
    %c0_26 = arith.constant 0 : index
    %c256 = arith.constant 256 : index
    %41 = vector.load %arg2[%c0_26, %c256] : memref<60x640xbf16, #tpu.memory_space<vmem>>, vector<60x128xbf16>
    %cst_27 = arith.constant dense<0.000000e+00> : vector<128x128xf32>
    %42 = tpu.matmul %0, %41, %cst_27 {dimension_numbers = #tpu.dot_dimension_numbers<[1], [0], [0], [1], [0, 0, 1, 1], [], []>} : vector<128x60xbf16>, vector<60x128xbf16>, vector<128x128xf32> -> vector<128x128xf32>
    %43 = vector.broadcast %9 : vector<1x128xf32> to vector<128x128xf32>
    %44 = arith.addf %42, %43 : vector<128x128xf32>
    %cst_28 = arith.constant 0.00999999977 : f32
    %45 = vector.broadcast %cst_28 : f32 to vector<128x128xf32>
    %46 = arith.mulf %45, %44 : vector<128x128xf32>
    %47 = arith.maximumf %44, %46 : vector<128x128xf32>
    %c0_29 = arith.constant 0 : index
    %c256_30 = arith.constant 256 : index
    %48 = vector.load %arg3[%c0_29, %c256_30] : memref<60x512xbf16, #tpu.memory_space<vmem>>, vector<60x128xbf16>
    %cst_31 = arith.constant dense<0.000000e+00> : vector<128x128xf32>
    %49 = tpu.matmul %8, %48, %cst_31 {dimension_numbers = #tpu.dot_dimension_numbers<[1], [0], [0], [1], [0, 0, 1, 1], [], []>} : vector<128x60xbf16>, vector<60x128xbf16>, vector<128x128xf32> -> vector<128x128xf32>
    %50 = math.tanh %49 : vector<128x128xf32>
    %51 = arith.mulf %47, %50 : vector<128x128xf32>
    %52 = arith.truncf %51 : vector<128x128xf32> to vector<128x128xbf16>
    %c256_32 = arith.constant 256 : index
    %c0_33 = arith.constant 0 : index
    %53 = vector.load %arg4[%c256_32, %c0_33] : memref<512x128xbf16, #tpu.memory_space<vmem>>, vector<128x128xbf16>
    %cst_34 = arith.constant dense<0.000000e+00> : vector<128x128xf32>
    %54 = tpu.matmul %52, %53, %cst_34 {dimension_numbers = #tpu.dot_dimension_numbers<[1], [0], [0], [1], [0, 0, 1, 1], [], []>} : vector<128x128xbf16>, vector<128x128xbf16>, vector<128x128xf32> -> vector<128x128xf32>
    %55 = arith.addf %40, %54 : vector<128x128xf32>
    %c0_35 = arith.constant 0 : index
    %c384 = arith.constant 384 : index
    %56 = vector.load %arg2[%c0_35, %c384] : memref<60x640xbf16, #tpu.memory_space<vmem>>, vector<60x128xbf16>
    %cst_36 = arith.constant dense<0.000000e+00> : vector<128x128xf32>
    %57 = tpu.matmul %0, %56, %cst_36 {dimension_numbers = #tpu.dot_dimension_numbers<[1], [0], [0], [1], [0, 0, 1, 1], [], []>} : vector<128x60xbf16>, vector<60x128xbf16>, vector<128x128xf32> -> vector<128x128xf32>
    %58 = vector.broadcast %9 : vector<1x128xf32> to vector<128x128xf32>
    %59 = arith.addf %57, %58 : vector<128x128xf32>
    %cst_37 = arith.constant 0.00999999977 : f32
    %60 = vector.broadcast %cst_37 : f32 to vector<128x128xf32>
    %61 = arith.mulf %60, %59 : vector<128x128xf32>
    %62 = arith.maximumf %59, %61 : vector<128x128xf32>
    %c0_38 = arith.constant 0 : index
    %c384_39 = arith.constant 384 : index
    %63 = vector.load %arg3[%c0_38, %c384_39] : memref<60x512xbf16, #tpu.memory_space<vmem>>, vector<60x128xbf16>
    %cst_40 = arith.constant dense<0.000000e+00> : vector<128x128xf32>
    %64 = tpu.matmul %8, %63, %cst_40 {dimension_numbers = #tpu.dot_dimension_numbers<[1], [0], [0], [1], [0, 0, 1, 1], [], []>} : vector<128x60xbf16>, vector<60x128xbf16>, vector<128x128xf32> -> vector<128x128xf32>
    %65 = math.tanh %64 : vector<128x128xf32>
    %66 = arith.mulf %62, %65 : vector<128x128xf32>
    %67 = arith.truncf %66 : vector<128x128xf32> to vector<128x128xbf16>
    %c384_41 = arith.constant 384 : index
    %c0_42 = arith.constant 0 : index
    %68 = vector.load %arg4[%c384_41, %c0_42] : memref<512x128xbf16, #tpu.memory_space<vmem>>, vector<128x128xbf16>
    %cst_43 = arith.constant dense<0.000000e+00> : vector<128x128xf32>
    %69 = tpu.matmul %67, %68, %cst_43 {dimension_numbers = #tpu.dot_dimension_numbers<[1], [0], [0], [1], [0, 0, 1, 1], [], []>} : vector<128x128xbf16>, vector<128x128xbf16>, vector<128x128xf32> -> vector<128x128xf32>
    %70 = arith.addf %55, %69 : vector<128x128xf32>
    %c0_44 = arith.constant 0 : index
    %c512 = arith.constant 512 : index
    %71 = vector.load %arg2[%c0_44, %c512] : memref<60x640xbf16, #tpu.memory_space<vmem>>, vector<60x128xbf16>
    %cst_45 = arith.constant dense<0.000000e+00> : vector<128x128xf32>
    %72 = tpu.matmul %0, %71, %cst_45 {dimension_numbers = #tpu.dot_dimension_numbers<[1], [0], [0], [1], [0, 0, 1, 1], [], []>} : vector<128x60xbf16>, vector<60x128xbf16>, vector<128x128xf32> -> vector<128x128xf32>
    %73 = vector.broadcast %10 : vector<1x128xf32> to vector<128x128xf32>
    %74 = arith.addf %70, %73 : vector<128x128xf32>
    %cst_46 = arith.constant 0.00999999977 : f32
    %75 = vector.broadcast %cst_46 : f32 to vector<128x128xf32>
    %76 = arith.mulf %75, %74 : vector<128x128xf32>
    %77 = arith.maximumf %74, %76 : vector<128x128xf32>
    %78 = arith.truncf %77 : vector<128x128xf32> to vector<128x128xbf16>
    %c0_47 = arith.constant 0 : index
    %c0_48 = arith.constant 0 : index
    %79 = vector.load %arg5[%c0_47, %c0_48] : memref<128x384xbf16, #tpu.memory_space<vmem>>, vector<128x128xbf16>
    %cst_49 = arith.constant dense<0.000000e+00> : vector<128x128xf32>
    %80 = tpu.matmul %78, %79, %cst_49 {dimension_numbers = #tpu.dot_dimension_numbers<[1], [0], [0], [1], [0, 0, 1, 1], [], []>} : vector<128x128xbf16>, vector<128x128xbf16>, vector<128x128xf32> -> vector<128x128xf32>
    %81 = arith.addf %80, %18 : vector<128x128xf32>
    %82 = arith.truncf %81 : vector<128x128xf32> to vector<128x128xbf16>
    %c0_50 = arith.constant 0 : index
    %c128_51 = arith.constant 128 : index
    %83 = vector.load %arg5[%c0_50, %c128_51] : memref<128x384xbf16, #tpu.memory_space<vmem>>, vector<128x128xbf16>
    %cst_52 = arith.constant dense<0.000000e+00> : vector<128x128xf32>
    %84 = tpu.matmul %82, %83, %cst_52 {dimension_numbers = #tpu.dot_dimension_numbers<[1], [0], [0], [1], [0, 0, 1, 1], [], []>} : vector<128x128xbf16>, vector<128x128xbf16>, vector<128x128xf32> -> vector<128x128xf32>
    %85 = vector.broadcast %11 : vector<1x128xf32> to vector<128x128xf32>
    %86 = arith.addf %84, %85 : vector<128x128xf32>
    %cst_53 = arith.constant 0.00999999977 : f32
    %87 = vector.broadcast %cst_53 : f32 to vector<128x128xf32>
    %88 = arith.mulf %87, %86 : vector<128x128xf32>
    %89 = arith.maximumf %86, %88 : vector<128x128xf32>
    %90 = arith.truncf %89 : vector<128x128xf32> to vector<128x128xbf16>
    %c0_54 = arith.constant 0 : index
    %c256_55 = arith.constant 256 : index
    %91 = vector.load %arg5[%c0_54, %c256_55] : memref<128x384xbf16, #tpu.memory_space<vmem>>, vector<128x128xbf16>
    %cst_56 = arith.constant dense<0.000000e+00> : vector<128x128xf32>
    %92 = tpu.matmul %90, %91, %cst_56 {dimension_numbers = #tpu.dot_dimension_numbers<[1], [0], [0], [1], [0, 0, 1, 1], [], []>} : vector<128x128xbf16>, vector<128x128xbf16>, vector<128x128xf32> -> vector<128x128xf32>
    %93 = arith.addf %92, %72 : vector<128x128xf32>
    %c0_57 = arith.constant 0 : index
    %c0_58 = arith.constant 0 : index
    %94 = vector.load %arg7[%c0_57, %c0_58] : memref<128x128xf32, #tpu.memory_space<vmem>>, vector<128x128xf32>
    tpu.vector_store %arg7[%c0_57, %c0_58], %93 {strides = array<i32>} : memref<128x128xf32, #tpu.memory_space<vmem>>, vector<128x128xf32>,
    return
  }
  func.func @transform_0(%arg0: i32) -> (i32, i32) {
    %c0_i32 = arith.constant 0 : i32
    %c0_i32_0 = arith.constant 0 : i32
    return %arg0, %c0_i32 : i32, i32
  }
  func.func @transform_1(%arg0: i32) -> (i32, i32) {
    %c0_i32 = arith.constant 0 : i32
    %c0_i32_0 = arith.constant 0 : i32
    %c0_i32_1 = arith.constant 0 : i32
    return %c0_i32, %c0_i32_0 : i32, i32
  }
  func.func @transform_2(%arg0: i32) -> (i32, i32) {
    %c0_i32 = arith.constant 0 : i32
    %c0_i32_0 = arith.constant 0 : i32
    %c0_i32_1 = arith.constant 0 : i32
    return %c0_i32, %c0_i32_0 : i32, i32
  }
  func.func @transform_3(%arg0: i32) -> (i32, i32) {
    %c0_i32 = arith.constant 0 : i32
    %c0_i32_0 = arith.constant 0 : i32
    %c0_i32_1 = arith.constant 0 : i32
    return %c0_i32, %c0_i32_0 : i32, i32
  }
  func.func @transform_4(%arg0: i32) -> (i32, i32) {
    %c0_i32 = arith.constant 0 : i32
    %c0_i32_0 = arith.constant 0 : i32
    %c0_i32_1 = arith.constant 0 : i32
    return %c0_i32, %c0_i32_0 : i32, i32
  }
  func.func @transform_5(%arg0: i32) -> (i32, i32) {
    %c0_i32 = arith.constant 0 : i32
    %c0_i32_0 = arith.constant 0 : i32
    %c0_i32_1 = arith.constant 0 : i32
    return %c0_i32, %c0_i32_0 : i32, i32
  }
  func.func @transform_6(%arg0: i32) -> (i32, i32) {
    %c0_i32 = arith.constant 0 : i32
    %c0_i32_0 = arith.constant 0 : i32
    return %arg0, %c0_i32 : i32, i32
  }
}

</mosaic_0001>

<bundles_post_ra>
// kernel: tpu_custom_call.1
= control target key start
LH: loop header
LB: loop body
LE: loop exit
PB: predicated region body
PF: predicated region fallthrough
CT: control target
= control target key end

     0   :  { %s5648_s0 = inlined_call_operand.vmem [shape: bf16[256,60], index: 0, kind: input, shape index: {}]   ;;  %s5649_s1 = inlined_call_operand.hbm [shape: bf16[60,640], index: 1, kind: input, shape index: {}]   ;;  %s5650_s2 = inlined_call_operand.hbm [shape: bf16[60,512], index: 2, kind: input, shape index: {}]   ;;  %s5651_s3 = inlined_call_operand.hbm [shape: bf16[512,128], index: 3, kind: input, shape index: {}]   ;;  %s5652_s4 = inlined_call_operand.vmem [shape: bf16[128,384], index: 4, kind: input, shape index: {}]   ;;  %s5653_s5 = inlined_call_operand.vmem [shape: f32[3,128], index: 5, kind: input, shape index: {}]   ;;  %s5654_s6 = inlined_call_operand.hbm [shape: f32[256,128], index: 6, kind: output, shape index: {}]  }
   0x1   :  { %5672 = sst [smem:[#allocation27_spill]] %s5650_s2 }
   0x2   :  { %11 = vsyncpa [#allocation3], 0 }
   0x3   :  { %12 = vsyncpa [#allocation6], 0 }
   0x4   :  { %13 = vsyncpa [#allocation4], 0 }
   0x5   :  { %15 = vsyncpa [#allocation4 + $0x1], 0  ;;  %s4789_s21 = smov 0   ;;  %s4791_s22 = smov 0  }
   0x6   :  { %s4793_s23 = smov 0   ;;  %s4795_s24 = smov 0  }
   0x7 LB: > { %s4810_s25 = sadd.s32 4294967295, %s4740_s24   ;;  %s3344_s26 = sadd.s32 4294967294, %s4740_s24   ;;  %s4740_s24 = sphi %s4795_s24, %s5727_s24   ;;  %s4736_s23 = sphi %s4793_s23, %s5726_s23   ;;  %s4732_s22 = sphi %s4791_s22, %s5725_s22   ;;  %s4728_s21 = sphi %s4789_s21, %s5724_s21  }
   0x8   : > { %s4814_s27 = sadd.s32 1, %s4740_s24   ;;  %s159_s28 = sadd.s32 1, %s4736_s23 }
   0x9   : > { %s156_s29 = ssub.s32 %s4740_s24, %s4814_s27  ;;  %p169_p0 = scmp.ne.s32.totalorder %s4736_s23, %s4732_s22 }
   0xa   : > { %p157_p1 = scmp.eq.s32.totalorder %s156_s29, 0  ;;  %p170_p2 = scmp.eq.s32.totalorder %s4810_s25, 1 }
   0xb   : > { %p175_p3 = scmp.ne.s32.totalorder %s4732_s22, %s4728_s21  ;;  %p176_p4 = scmp.eq.s32.totalorder %s3344_s26, 1 }
   0xc   : > { %s4825_s30 = scalar_select %p157_p1, %s4736_s23, %s159_s28  }
   0xd   : > { %p4827_p5 = por %p170_p2, %p169_p0  ;;  %p4831_p6 = por %p176_p4, %p175_p3 }
   0xe   : > { %5673 = sst [smem:[#allocation12_spill]] %s4825_s30  ;;  %p3345_p7 = scmp.ge.s32.totalorder %s4740_s24, 1 }
   0xf   : > { %s5674_s7 = scalar_select %p4827_p5, 1, 0 }
  0x10   : > { %s5675_s8 = scalar_select %p4831_p6, 1, 0 }
  0x11   : > { %p183_p8 = scmp.lt.s32.totalorder %s4740_s24, 3  ;;  %p5655_p9 = scmp.eq.s32.totalorder %s4810_s25, 0 }
  0x12   : > { %s4742_s10 = smov [#allocation5]   ;;  %s4743_s13 = smov [#allocation2]  }
  0x13   : > { %p4838_p10 = pnand %p3345_p7, %p183_p8  ;;  %s208_s11 = sshll.u32 %s4742_s10, 4  ;;  %s209_s11 = int_to_ptr.vmem [resolvable:$true] %s208_s11 }
  0x14   : > { %s195_s14 = sshll.u32 %s4743_s13, 4  ;;  %s5678_s2 = sld [smem:[#allocation27_spill]]  ;;  %s4850_s14 = int_to_ptr.vmem [resolvable:$true] %s195_s14 }
  0x15   : > { %s5676_s9 = scalar_select %p4838_p10, 1, 0 }
  0x16   : > { %p4285_p11 = pneg %p4838_p10 }
  0x18   : > { %p4846_p12 = pnand %p5655_p9, %p4285_p11 }
  0x1a   : > { %s4586_s17 = scalar_lea.hbm %s5678_s2, 2048  ;;  %p4860_p0 = pneg %p4846_p12 }
  0x1b   : > { %p4587_p13 = scmp.ne.s32.totalorder %s5678_s2, %s4586_s17  ;;  %p4593_p3 = scmp.lt.u32.totalorder %s4586_s17, %s5678_s2 }
  0x1d   : > { %p4589_p1 = pnand %p4860_p0, %p4587_p13 }
  0x1f   : > { %p4590_p2 = pneg %p4589_p1 }
  0x21   : > { %p4595_p4 = pnand %p4593_p3, %p4590_p2 }
  0x23   : > { %4598 = shalt.err (!%p4595_p4)
}
  0x24   : > { %s4599_s29 = scalar_lea.vmem %s209_s11, 2048  ;;  %p4607_p9 = scmp.lt.s32.totalorder %s209_s11, %s209_s11 }
  0x25   : > { %p4600_p7 = scmp.ne.s32.totalorder %s209_s11, %s4599_s29  ;;  %p4608_p6 = scmp.lt.s32.totalorder %s4599_s29, %s4599_s29 }
  0x27   : > { %p4602_p8 = pnand %p4600_p7, %p4860_p0  ;;  %p4609_p5 = por %p4608_p6, %p4607_p9 }
  0x29   : > { %p4603_p11 = pneg %p4602_p8 }
  0x2b   : > { %p4610_p10 = pnand %p4609_p5, %p4603_p11 }
  0x2d   : > { %4613 = shalt.err (!%p4610_p10)
}
  0x2e   : > { %s4744_s10 = smov 256   ;;  %s4745_s13 = smov 16  }
  0x2f   : > { %4291 = dma.hbm_to_vmem [thread:$0]  (!%p4846_p12), %s5678_s2, 2048, %s209_s11, [#allocation6], %s4744_s10, %s4744_s10, %s4745_s13  }
  0x30   : > { %s4614_s19 = scalar_lea.hbm %s5649_s1, 2560 }
  0x31   : > { %p4615_p13 = scmp.ne.s32.totalorder %s5649_s1, %s4614_s19  ;;  %p4621_p9 = scmp.lt.u32.totalorder %s4614_s19, %s5649_s1 }
  0x33   : > { %p4617_p5 = pnand %p4615_p13, %p4860_p0 }
  0x35   : > { %p4618_p6 = pneg %p4617_p5 }
  0x37   : > { %p4623_p10 = pnand %p4621_p9, %p4618_p6 }
  0x39   : > { %4626 = shalt.err (!%p4623_p10)
}
  0x3a   : > { %s4627_s11 = scalar_lea.vmem %s4850_s14, 2560  ;;  %p4635_p4 = scmp.lt.s32.totalorder %s4850_s14, %s4850_s14 }
  0x3b   : > { %p4628_p1 = scmp.ne.s32.totalorder %s4850_s14, %s4627_s11  ;;  %p4636_p7 = scmp.lt.s32.totalorder %s4627_s11, %s4627_s11 }
  0x3d   : > { %p4630_p2 = pnand %p4628_p1, %p4860_p0  ;;  %p4637_p8 = por %p4636_p7, %p4635_p4 }
  0x3f   : > { %p4631_p3 = pneg %p4630_p2 }
  0x41   : > { %p4638_p11 = pnand %p4637_p8, %p4631_p3 }
  0x43   : > { %4641 = shalt.err (!%p4638_p11)
}
  0x44   : > { %s4746_s10 = smov 320   ;;  %s4747_s30 = smov 20  }
  0x45   : > { %4288 = dma.hbm_to_vmem [thread:$0]  (!%p4846_p12), %s5649_s1, 2560, %s4850_s14, [#allocation3], %s4746_s10, %s4746_s10, %s4747_s30  }
  0x46   : > { %s4748_s16 = smov [#allocation7]   ;;  %s4642_s26 = scalar_lea.hbm %s5651_s3, 4096 }
  0x47   : > { %s221_s17 = sshll.u32 %s4748_s16, 4  ;;  %p4643_p13 = scmp.ne.s32.totalorder %s5651_s3, %s4642_s26  ;;  %s222_s17 = int_to_ptr.vmem [resolvable:$true] %s221_s17 }
  0x48   : > { %p4649_p9 = scmp.lt.u32.totalorder %s4642_s26, %s5651_s3 }
  0x49   : > { %p4645_p5 = pnand %p4643_p13, %p4860_p0 }
  0x4b   : > { %p4646_p6 = pneg %p4645_p5 }
  0x4d   : > { %p4651_p10 = pnand %p4649_p9, %p4646_p6 }
  0x4f   : > { %4654 = shalt.err (!%p4651_p10)
}
  0x50   : > { %s4655_s14 = scalar_lea.vmem %s222_s17, 4096  ;;  %p4663_p4 = scmp.lt.s32.totalorder %s222_s17, %s222_s17 }
  0x51   : > { %p4656_p1 = scmp.ne.s32.totalorder %s222_s17, %s4655_s14  ;;  %p4664_p7 = scmp.lt.s32.totalorder %s4655_s14, %s4655_s14 }
  0x53   : > { %p4658_p2 = pnand %p4656_p1, %p4860_p0  ;;  %p4665_p8 = por %p4664_p7, %p4663_p4 }
  0x55   : > { %p4659_p3 = pneg %p4658_p2 }
  0x57   : > { %p4666_p11 = pnand %p4665_p8, %p4659_p3 }
  0x59   : > { %4669 = shalt.err (!%p4666_p11)
}
  0x5a   : > { %s4749_s10 = smov 64   ;;  %s4750_s30 = smov 4  }
  0x5b   : > { %4294 = dma.hbm_to_vmem [thread:$0]  (!%p4846_p12), %s5651_s3, 4096, %s222_s17, [#allocation6], %s4749_s10, %s4749_s10, %s4750_s30  }
  0x5c   : > { %p5680_p13 = scmp.ne.s32.totalorder %s5676_s9, 0 }
  0x5e   : > { %252 = sbr.rel (%p5680_p13) target bundleno = 1639 (0x667), region = 44 }
  0x65   : > { %p5681_p5 = scmp.eq.s32.totalorder %s4810_s25, 0 }
  0x67   : > { %4715 = dma.done.wait (%p5681_p5), [#allocation3], 2560   ;;  %p5682_p0 = pmov %p5681_p5 }
  0x69   : > { %4717 = vsyncadd (%p5682_p0), [#allocation3], 4294964736  ;;  %p5683_p6 = pmov %p5682_p0 }
  0x6a   : > { %p5684_p9 = pmov %p5682_p0 }
  0x6b   : > { %4719 = dma.done.wait (%p5683_p6), [#allocation6], 6144  }
  0x6c   : > { %4721 = vsyncadd (%p5684_p9), [#allocation6], 4294961152  ;;  %s3355_s12 = sshll.u32 %s4810_s25, 4  ;;  %vm489_vm0 = vcmask 1045504   ;;  %vm464_vm1 = vcmask 490496   ;;  %s287_s29 = sand.u32 1, %s4732_s22  }
  0x6d   : > { %p291_p10 = scmp.lt.s32.totalorder %s3355_s12, 31  ;;  %v4349_v0 = vld [vmem:[#allocation5] ss:$16 sps:$4 sm:$0xff]   ;;  %v4352_v3 = vld [vmem:[#allocation2 + $0x28] ss:$20 sps:$4 sm:$0xff]   ;;  %s3354_s11 = sshll.u32 %s287_s29, 7 }
  0x6e   : > { %v4350_v1 = vld [vmem:[#allocation2] ss:$20 sps:$4 sm:$0xff]   ;;  %3782 = vmatprep.subr.bf16.mxu1 %v4349_v0  ;;  %v4354_v5 = vld [vmem:[#allocation2 + $0x50] ss:$20 sps:$4 sm:$0xff]   ;;  %s5578_s14 = scalar_lea.vmem [#allocation8], %s3354_s11  ;;  %s3537_s10 = sshll.u32 %s4810_s25, 11 }
  0x6f   : > { %s5729_s12 = smov (!%p291_p10, %s3355_s12), 31  ;;  %v4351_v2 = vld [vmem:[#allocation5 + $0x20] ss:$16 sps:$4 sm:$0xff]   ;;  %3758 = vmatprep.subr.bf16.mxu0 %v4350_v1  ;;  %3783 = vmatpush3.bf16.msra.mxu1 %v4349_v0  ;;  %v4356_v8 = vld [vmem:[#allocation2 + $0x78] ss:$20 sps:$4 sm:$0x3f]  }
  0x70   : > { %s3356_s20 = sshll.u32 %s5729_s12, 2  ;;  %3759 = vmatpush3.bf16.msra.mxu0 %v4350_v1  ;;  %3784 = vmatprep.subr.bf16.mxu1 %v4351_v2  ;;  %v4353_v4 = vld [vmem:[#allocation5 + $0x40] ss:$16 sps:$4 sm:$0xff]   ;;  %v491_v16 = vsel %vm489_vm0, %v4356_v8, 0  ;;  %v4358_v19 = vld [vmem:[#allocation5 + $0x4] ss:$16 sps:$4 sm:$0xff]   ;;  %s5598_s12 = scalar_lea.hbm %s5654_s6, %s3537_s10 }
  0x71   : > { %s4931_s16 = scalar_lea.vmem %s5648_s0, %s3356_s20  ;;  %3760 = vmatprep.subr.bf16.mxu0 %v4352_v3  ;;  %v4355_v6 = vld [vmem:[#allocation5 + $0x60] ss:$16 sps:$4 sm:$0x3f]   ;;  %v4360_v27 = vld [vmem:[#allocation2 + $0x4] ss:$20 sps:$4 sm:$0xff]   ;;  %s3251_s30 = sshll.u32 %s5578_s14, 4  ;;  %s5600_s30 = int_to_ptr.vmem [resolvable:$true] %s3251_s30 }
  0x72   : > { %v4934_v7 = vld [vmem:[%s4931_s16] sm:$0xff]   ;;  %v4939_v11 = vld [vmem:[%s4931_s16 + $0x8] sm:$0xff]   ;;  %v678_v12 = vsel %vm489_vm0, %v4355_v6, 0  ;;  %v4945_v15 = vld [vmem:[%s4931_s16 + $0x10] sm:$0xff]   ;;  %s5607_s25 = scalar_lea.sflag [#allocation4], %s287_s29  ;;  %s4670_s20 = scalar_lea.vmem %s5600_s30, 2048 }
  0x73   : > { %3785 = vmatpush3.bf16.msra.mxu1 %v4351_v2  ;;  %v314_v9 = vunpack.c.l.bf16 %v4934_v7  ;;  %v315_v10 = vunpack.c.h.bf16 %v4934_v7  ;;  %v316_v13 = vunpack.c.l.bf16 %v4939_v11  ;;  %v317_v14 = vunpack.c.h.bf16 %v4939_v11  ;;  %3766 = vmatprep.mubr.msk.bf16.mxu0 %vm464_vm1, %v4934_v7  ;;  %v4952_v21 = vld [vmem:[%s4931_s16 + $0x18] sm:$0xff]   ;;  %v4362_v45 = vld [vmem:[#allocation5 + $0x24] ss:$16 sps:$4 sm:$0xff]   ;;  %v4364_v51 = vld [vmem:[#allocation2 + $0x2c] ss:$20 sps:$4 sm:$0xff]   ;;  %p4671_p12 = scmp.ne.s32.totalorder %s5600_s30, %s4670_s20  ;;  %p5721_p1 = scmp.ne.s32.totalorder %s5674_s7, 0 }
  0x74   : > { %3761 = vmatpush3.bf16.msra.mxu0 %v4352_v3  ;;  %3786 = vmatprep.subr.bf16.mxu1 %v4353_v4  ;;  %v318_v20 = vunpack.c.l.bf16 %v4945_v15  ;;  %v319_v24 = vunpack.c.h.bf16 %v4945_v15  ;;  %v320_v28 = vunpack.c.l.bf16 %v4952_v21  ;;  %v321_v29 = vunpack.c.h.bf16 %v4952_v21  ;;  %v4966_v52 = vld [vmem:[%s4931_s16 + $0x20] sm:$0xff]   ;;  %v4969_v53 = vld [vmem:[%s4931_s16 + $0x28] sm:$0xff]   ;;  %v4986_v63 = vld [vmem:[%s4931_s16 + $0x30] sm:$0xff]   ;;  %s4751_s9 = smov [#allocation8]  }
  0x75   : > { %3762 = vmatprep.subr.bf16.mxu0 %v4354_v5  ;;  %v330_v17 = vmul.f32 0.2, %v314_v9  ;;  %v331_v18 = vmul.f32 0.2, %v315_v10  ;;  %v332_v22 = vmul.f32 0.2, %v316_v13  ;;  %v322_v55 = vunpack.c.l.bf16 %v4966_v52  ;;  %p4672_p2 = pnand %p4671_p12, %p5721_p1 }
  0x76   : > { %v333_v23 = vmul.f32 0.2, %v317_v14  ;;  %v334_v32 = vmul.f32 0.2, %v318_v20  ;;  %v335_v33 = vmul.f32 0.2, %v319_v24  ;;  %v323_v56 = vunpack.c.h.bf16 %v4966_v52 }
  0x77   : > { %3787 = vmatpush3.bf16.msra.mxu1 %v4353_v4  ;;  %v346_v25 = vsub.f32 1.0, %v330_v17  ;;  %v347_v26 = vsub.f32 1.0, %v331_v18  ;;  %v348_v30 = vsub.f32 1.0, %v332_v22  ;;  %v336_v36 = vmul.f32 0.2, %v320_v28  ;;  %v4989_v0 = vld [vmem:[%s4931_s16 + $0x38] sm:$0xff]   ;;  %p4673_p3 = pneg %p4672_p2 }
  0x78   : > { %3763 = vmatpush3.bf16.msra.mxu0 %v4354_v5  ;;  %4263 = vmatprep.subr.msk.bf16.mxu1 %vm489_vm0, %v4355_v6  ;;  %v349_v31 = vsub.f32 1.0, %v333_v23  ;;  %v337_v37 = vmul.f32 0.2, %v321_v29  ;;  %v350_v40 = vsub.f32 1.0, %v334_v32  ;;  %v351_v41 = vsub.f32 1.0, %v335_v33  ;;  %s4674_s15 = sshll.u32 %s4751_s9, 4  ;;  %s4675_s15 = int_to_ptr.vmem [resolvable:$false] %s4674_s15 }
  0x79   : > { %4262 = vmatprep.subr.msk.bf16.mxu0 %vm489_vm0, %v4356_v8  ;;  %v362_v34 = vmax.f32 %v346_v25, 0.0  ;;  %v363_v35 = vmax.f32 %v347_v26, 0.0  ;;  %v364_v38 = vmax.f32 %v348_v30, 0.0  ;;  %v352_v43 = vsub.f32 1.0, %v336_v36  ;;  %v4366_v57 = vld [vmem:[#allocation5 + $0x44] ss:$16 sps:$4 sm:$0xff]   ;;  %p4677_p4 = scmp.lt.s32.totalorder %s5600_s30, %s4675_s15 }
  0x7a   : > { %v365_v39 = vmax.f32 %v349_v31, 0.0  ;;  %v353_v44 = vsub.f32 1.0, %v337_v37  ;;  %v366_v47 = vmax.f32 %v350_v40, 0.0  ;;  %v367_v48 = vmax.f32 %v351_v41, 0.0  ;;  %v4368_v60 = vld [vmem:[#allocation2 + $0x54] ss:$20 sps:$4 sm:$0xff]  }
  0x7b   : > { %3789 = vmatpush3.bf16.msra.mxu1 %v678_v12  ;;  %v4959_v42 = vpack.c.bf16 %v363_v35, %v362_v34  ;;  %v368_v49 = vmax.f32 %v352_v43, 0.0  ;;  %v324_v58 = vunpack.c.l.bf16 %v4969_v53  ;;  %v325_v59 = vunpack.c.h.bf16 %v4969_v53  ;;  %v4372_v30 = vld [vmem:[#allocation2 + $0x7c] ss:$20 sps:$4 sm:$0x3f]   ;;  %s4676_s16 = scalar_lea.vmem %s4675_s15, 4096 }
  0x7c   : > { %3765 = vmatpush3.bf16.msra.mxu0 %v491_v16  ;;  %3830 = vmatprep.subr.bf16.mxu1 %v4358_v19  ;;  %v4961_v46 = vpack.c.bf16 %v365_v39, %v364_v38  ;;  %v369_v50 = vmax.f32 %v353_v44, 0.0  ;;  %v4975_v54 = vpack.c.bf16 %v367_v48, %v366_v47  ;;  %v338_v61 = vmul.f32 0.2, %v322_v55  ;;  %v4373_v33 = vld [vmem:[#allocation2 + $0x8] ss:$20 sps:$4 sm:$0xff]   ;;  %v4381_v55 = vld [vmem:[#allocation7 + $0x40] sm:$0xff]   ;;  %p4678_p7 = scmp.lt.s32.totalorder %s4676_s16, %s4670_s20 }
  0x7d   : > { %3806 = vmatprep.subr.bf16.mxu0 %v4360_v27  ;;  %3790 = vmatprep.mubr.msk.bf16.mxu1 %vm464_vm1, %v4959_v42  ;;  %v339_v62 = vmul.f32 0.2, %v323_v56  ;;  %v340_v1 = vmul.f32 0.2, %v324_v58  ;;  %v341_v2 = vmul.f32 0.2, %v325_v59  ;;  %v326_v3 = vunpack.c.l.bf16 %v4986_v63 }
  0x7e   : > { %3791 = vmatmul.mubr.msk.bf16.vlgmr.msra.gmra.mrb[0].mxu1 %vm464_vm1, %v4961_v46  ;;  %v327_v4 = vunpack.c.h.bf16 %v4986_v63  ;;  %v4993_v5 = vpack.c.bf16 %v369_v50, %v368_v49  ;;  %v354_v6 = vsub.f32 1.0, %v338_v61  ;;  %v328_v9 = vunpack.c.l.bf16 %v4989_v0  ;;  %v4376_v40 = vld [vmem:[#allocation2 + $0x80] ss:$20 sps:$4 sm:$0x3f]   ;;  %v4374_v44 = vld [vmem:[#allocation2 + $0x30] ss:$20 sps:$4 sm:$0xff]   ;;  %p4679_p8 = por %p4678_p7, %p4677_p4 }
  0x7f   : > { %3767 = vmatmul.mubr.msk.bf16.vlgmr.msra.gmra.mrb[0].mxu0 %vm464_vm1, %v4939_v11  ;;  %3831 = vmatpush3.bf16.msra.mxu1 %v4358_v19  ;;  %v355_v8 = vsub.f32 1.0, %v339_v62  ;;  %v356_v10 = vsub.f32 1.0, %v340_v1  ;;  %v357_v12 = vsub.f32 1.0, %v341_v2  ;;  %v342_v13 = vmul.f32 0.2, %v326_v3  ;;  %v4382_v56 = vld [vmem:[#allocation7 + $0x48] sm:$0xff]  }
  0x80   : > { %3807 = vmatpush3.bf16.msra.mxu0 %v4360_v27  ;;  %3794 = vmatprep.mubr.msk.bf16.mxu1 %vm464_vm1, %v4975_v54  ;;  %v343_v14 = vmul.f32 0.2, %v327_v4  ;;  %v370_v16 = vmax.f32 %v354_v6, 0.0  ;;  %v329_v18 = vunpack.c.h.bf16 %v4989_v0  ;;  %v344_v19 = vmul.f32 0.2, %v328_v9  ;;  %v4384_v58 = vld [vmem:[#allocation7 + $0x58] sm:$0xff]   ;;  %p4680_p11 = pnand %p4679_p8, %p4673_p3 }
  0x81   : > { %3770 = vmatprep.mubr.msk.bf16.mxu0 %vm464_vm1, %v4945_v15  ;;  %3832 = vmatprep.subr.bf16.mxu1 %v4362_v45  ;;  %v371_v17 = vmax.f32 %v355_v8, 0.0  ;;  %v372_v20 = vmax.f32 %v356_v10, 0.0  ;;  %v358_v22 = vsub.f32 1.0, %v342_v13  ;;  %v373_v25 = vmax.f32 %v357_v12, 0.0  ;;  %v4377_v47 = vld [vmem:[#allocation5 + $0x8] ss:$16 sps:$4 sm:$0xff]  }
  0x82   : > { %3808 = vmatprep.subr.bf16.mxu0 %v4364_v51  ;;  %v359_v23 = vsub.f32 1.0, %v343_v14  ;;  %v345_v26 = vmul.f32 0.2, %v329_v18  ;;  %v4370_v27 = vld [vmem:[#allocation5 + $0x64] ss:$16 sps:$4 sm:$0x3f]  }
  0x83   : > { %3833 = vmatpush3.bf16.msra.mxu1 %v4362_v45  ;;  %v5001_v24 = vpack.c.bf16 %v371_v17, %v370_v16  ;;  %v374_v28 = vmax.f32 %v358_v22, 0.0  ;;  %v1028_v31 = vsel %vm489_vm0, %v4370_v27, 0  ;;  %v865_v32 = vsel %vm489_vm0, %v4372_v30, 0  ;;  %v4375_v45 = vld [vmem:[#allocation2 + $0x58] ss:$20 sps:$4 sm:$0xff]   ;;  %v4385_v59 = vld [vmem:[#allocation7 + $0x60] sm:$0xff]  }
  0x84   : > { %3809 = vmatpush3.bf16.msra.mxu0 %v4364_v51  ;;  %3834 = vmatprep.subr.bf16.mxu1 %v4366_v57  ;;  %v375_v29 = vmax.f32 %v359_v23, 0.0  ;;  %v5011_v34 = vpack.c.bf16 %v373_v25, %v372_v20  ;;  %v360_v35 = vsub.f32 1.0, %v344_v19  ;;  %v361_v36 = vsub.f32 1.0, %v345_v26  ;;  %v4378_v48 = vld [vmem:[#allocation5 + $0x28] ss:$16 sps:$4 sm:$0xff]   ;;  %v4387_v61 = vld [vmem:[#allocation7 + $0x70] sm:$0xff]  }
  0x85   : > { %3810 = vmatprep.subr.bf16.mxu0 %v4368_v60  ;;  %v1505_v43 = vsel %vm489_vm0, %v4376_v40, 0  ;;  %v4379_v49 = vld [vmem:[#allocation5 + $0x48] ss:$16 sps:$4 sm:$0xff]   ;;  %v5099_v1 = vld [vmem:[#allocation7] sm:$0xff]   ;;  %v4410_v19 = vld [vmem:[#allocation2 + $0x5c] ss:$20 sps:$4 sm:$0xff]  }
  0x86   : > { %3795 = vmatmul.mubr.msk.bf16.gmra.mrb[4].mxu1 %vm464_vm1, %v4993_v5  ;;  %v5013_v37 = vpack.c.bf16 %v375_v29, %v374_v28  ;;  %v376_v38 = vmax.f32 %v360_v35, 0.0  ;;  %v377_v39 = vmax.f32 %v361_v36, 0.0  ;;  %v4380_v50 = vld [vmem:[#allocation5 + $0x68] ss:$16 sps:$4 sm:$0x3f]  }
  0x87   : > { %3771 = vmatmul.mubr.msk.bf16.gmra.mrb[4].mxu0 %vm464_vm1, %v4952_v21  ;;  %3835 = vmatpush3.bf16.msra.mxu1 %v4366_v57  ;;  %v1668_v51 = vsel %vm489_vm0, %v4380_v50, 0  ;;  %v4383_v57 = vld [vmem:[#allocation7 + $0x50] sm:$0xff]   ;;  %v4388_v62 = vld [vmem:[#allocation7 + $0x78] sm:$0xff]   ;;  %v4406_v2 = vld [vmem:[#allocation2 + $0xc] ss:$20 sps:$4 sm:$0xff]  }
  0x88   : > { %3774 = vmatprep.mubr.msk.bf16.mxu0 %vm464_vm1, %v4966_v52  ;;  %3798 = vmatprep.mubr.msk.bf16.mxu1 %vm464_vm1, %v5001_v24  ;;  %v5023_v41 = vpack.c.bf16 %v377_v39, %v376_v38  ;;  %v4408_v3 = vld [vmem:[#allocation2 + $0x34] ss:$20 sps:$4 sm:$0xff]   ;;  %v5105_v8 = vld [vmem:[%s5653_s5] ss:$0 sm:$0xff] }
  0x89   : > { %3811 = vmatpush3.bf16.msra.mxu0 %v4368_v60  ;;  %4265 = vmatprep.subr.msk.bf16.mxu1 %vm489_vm0, %v4370_v27  ;;  %v4386_v60 = vld [vmem:[#allocation7 + $0x68] sm:$0xff]  }
  0x8a   : > { %4264 = vmatprep.subr.msk.bf16.mxu0 %vm489_vm0, %v4372_v30 }
  0x8b   : > { %3837 = vmatpush3.bf16.msra.mxu1 %v1028_v31 }
  0x8c   : > { %3918 = vmatprep.subr.bf16.mxu1 %v4373_v33 }
  0x8d   : > { %3813 = vmatpush3.bf16.msra.mxu0 %v865_v32 }
  0x8e   : > { %3799 = vmatmul.mubr.msk.bf16.gmra.mrb[8].mxu1 %vm464_vm1, %v5011_v34  ;;  %3854 = vmatprep.subr.bf16.mxu0 %v4381_v55 }
  0x8f   : > { %3775 = vmatmul.mubr.msk.bf16.gmra.mrb[8].mxu0 %vm464_vm1, %v4969_v53  ;;  %3802 = vmatprep.mubr.msk.bf16.mxu1 %vm464_vm1, %v5013_v37 }
  0x90   : > { %3778 = vmatprep.mubr.msk.bf16.mxu0 %vm464_vm1, %v4986_v63 }
  0x96   : > { %3803 = vmatmul.mubr.msk.bf16.gmra.mrb[12].mxu1 %vm464_vm1, %v5023_v41 }
  0x97   : > { %3779 = vmatmul.mubr.msk.bf16.gmra.mrb[12].mxu0 %vm464_vm1, %v4989_v0  ;;  %3838 = vmatprep.mubr.msk.bf16.mxu1 %vm464_vm1, %v4959_v42 }
  0x98   : > { %3814 = vmatprep.mubr.msk.bf16.mxu0 %vm464_vm1, %v4934_v7 }
  0x9e   : > { %3839 = vmatmul.mubr.msk.bf16.vlgmr.msra.gmra.mrb[16].mxu1 %vm464_vm1, %v4961_v46 }
  0x9f   : > { %3815 = vmatmul.mubr.msk.bf16.vlgmr.msra.gmra.mrb[16].mxu0 %vm464_vm1, %v4939_v11  ;;  %3919 = vmatpush3.bf16.msra.mxu1 %v4373_v33 }
  0xa0   : > { %3842 = vmatprep.mubr.msk.bf16.mxu1 %vm464_vm1, %v4975_v54  ;;  %3818 = vmatprep.mubr.msk.bf16.mxu0 %vm464_vm1, %v4945_v15 }
  0xa1   : > { %3920 = vmatprep.subr.bf16.mxu1 %v4374_v44  ;;  %3855 = vmatpush3.bf16.msra.mxu0 %v4381_v55  ;;  %v4412_v55 = vld [vmem:[#allocation2 + $0x84] ss:$20 sps:$4 sm:$0x3f]  }
  0xa2   : > { %3856 = vmatprep.subr.bf16.mxu0 %v4382_v56 }
  0xa3   : > { %3921 = vmatpush3.bf16.msra.mxu1 %v4374_v44 }
  0xa4   : > { %3922 = vmatprep.subr.bf16.mxu1 %v4375_v45 }
  0xa5   : > { %3857 = vmatpush3.bf16.msra.mxu0 %v4382_v56 }
  0xa6   : > { %3843 = vmatmul.mubr.msk.bf16.gmra.mrb[20].mxu1 %vm464_vm1, %v4993_v5  ;;  %3858 = vmatprep.subr.bf16.mxu0 %v4383_v57 }
  0xa7   : > { %3819 = vmatmul.mubr.msk.bf16.gmra.mrb[20].mxu0 %vm464_vm1, %v4952_v21  ;;  %3846 = vmatprep.mubr.msk.bf16.mxu1 %vm464_vm1, %v5001_v24 }
  0xa8   : > { %3822 = vmatprep.mubr.msk.bf16.mxu0 %vm464_vm1, %v4966_v52  ;;  %3923 = vmatpush3.bf16.msra.mxu1 %v4375_v45 }
  0xa9   : > { %4266 = vmatprep.subr.msk.bf16.mxu1 %vm489_vm0, %v4376_v40  ;;  %3859 = vmatpush3.bf16.msra.mxu0 %v4383_v57 }
  0xaa   : > { %3860 = vmatprep.subr.bf16.mxu0 %v4384_v58 }
  0xac   : > { %3925 = vmatpush3.bf16.msra.mxu1 %v1505_v43 }
  0xad   : > { %3942 = vmatprep.subr.bf16.mxu1 %v4377_v47  ;;  %3861 = vmatpush3.bf16.msra.mxu0 %v4384_v58 }
  0xae   : > { %3847 = vmatmul.mubr.msk.bf16.gmra.mrb[24].mxu1 %vm464_vm1, %v5011_v34  ;;  %3862 = vmatprep.subr.bf16.mxu0 %v4385_v59 }
  0xaf   : > { %3823 = vmatmul.mubr.msk.bf16.gmra.mrb[24].mxu0 %vm464_vm1, %v4969_v53  ;;  %3850 = vmatprep.mubr.msk.bf16.mxu1 %vm464_vm1, %v5013_v37 }
  0xb0   : > { %3826 = vmatprep.mubr.msk.bf16.mxu0 %vm464_vm1, %v4986_v63 }
  0xb1   : > { %3863 = vmatpush3.bf16.msra.mxu0 %v4385_v59 }
  0xb2   : > { %3864 = vmatprep.subr.bf16.mxu0 %v4386_v60 }
  0xb5   : > { %3865 = vmatpush3.bf16.msra.mxu0 %v4386_v60 }
  0xb6   : > { %3851 = vmatmul.mubr.msk.bf16.gmra.mrb[28].mxu1 %vm464_vm1, %v5023_v41  ;;  %3866 = vmatprep.subr.bf16.mxu0 %v4387_v61 }
  0xb7   : > { %3827 = vmatmul.mubr.msk.bf16.gmra.mrb[28].mxu0 %vm464_vm1, %v4989_v0  ;;  %3926 = vmatprep.mubr.msk.bf16.mxu1 %vm464_vm1, %v4934_v7 }
  0xb9   : > { %3867 = vmatpush3.bf16.msra.mxu0 %v4387_v61  ;;  %v2016_v61 = vsel %vm489_vm0, %v4412_v55, 0 }
  0xba   : > { %3868 = vmatprep.subr.bf16.mxu0 %v4388_v62 }
  0xbd   : > { %3869 = vmatpush3.bf16.msra.mxu0 %v4388_v62 }
  0xbe   : > { %3927 = vmatmul.mubr.msk.bf16.vlgmr.msra.gmra.mrb[32].mxu1 %vm464_vm1, %v4939_v11  ;;  %3886 = vmatprep.subr.bf16.mxu0 %v5099_v1 }
  0xbf   : > { %3943 = vmatpush3.bf16.msra.mxu1 %v4377_v47  ;;  %3930 = vmatprep.mubr.msk.bf16.mxu1 %vm464_vm1, %v4945_v15 }
  0xc0   : > { %3944 = vmatprep.subr.bf16.mxu1 %v4378_v48 }
  0xc3   : > { %3945 = vmatpush3.bf16.msra.mxu1 %v4378_v48 }
  0xc4   : > { %3946 = vmatprep.subr.bf16.mxu1 %v4379_v49 }
  0xc6   : > { %3931 = vmatmul.mubr.msk.bf16.gmra.mrb[36].mxu1 %vm464_vm1, %v4952_v21 }
  0xc7   : > { %3934 = vmatprep.mubr.msk.bf16.mxu1 %vm464_vm1, %v4966_v52  ;;  %3947 = vmatpush3.bf16.msra.mxu1 %v4379_v49 }
  0xc8   : > { %4267 = vmatprep.subr.msk.bf16.mxu1 %vm489_vm0, %v4380_v50 }
  0xcb   : > { %3949 = vmatpush3.bf16.msra.mxu1 %v1668_v51 }
  0xcc   : > { %3998 = vmatprep.subr.bf16.mxu1 %v4406_v2 }
  0xce   : > { %3935 = vmatmul.mubr.msk.bf16.gmra.mrb[40].mxu1 %vm464_vm1, %v4969_v53 }
  0xcf   : > { %3938 = vmatprep.mubr.msk.bf16.mxu1 %vm464_vm1, %v4986_v63 }
  0xd6   : > { %3939 = vmatmul.mubr.msk.bf16.gmra.mrb[44].mxu1 %vm464_vm1, %v4989_v0 }
  0xd7   : > { %3950 = vmatprep.mubr.msk.bf16.mxu1 %vm464_vm1, %v4959_v42 }
  0xde   : > { %3951 = vmatmul.mubr.msk.bf16.vlgmr.msra.gmra.mrb[48].mxu1 %vm464_vm1, %v4961_v46 }
  0xdf   : > { %3954 = vmatprep.mubr.msk.bf16.mxu1 %vm464_vm1, %v4975_v54  ;;  %3999 = vmatpush3.bf16.msra.mxu1 %v4406_v2 }
  0xe0   : > { %4000 = vmatprep.subr.bf16.mxu1 %v4408_v3 }
  0xe3   : > { %4001 = vmatpush3.bf16.msra.mxu1 %v4408_v3 }
  0xe4   : > { %4002 = vmatprep.subr.bf16.mxu1 %v4410_v19 }
  0xe6   : > { %3955 = vmatmul.mubr.msk.bf16.gmra.mrb[52].mxu1 %vm464_vm1, %v4993_v5 }
  0xe7   : > { %3958 = vmatprep.mubr.msk.bf16.mxu1 %vm464_vm1, %v5001_v24  ;;  %4003 = vmatpush3.bf16.msra.mxu1 %v4410_v19 }
  0xe8   : > { %4268 = vmatprep.subr.msk.bf16.mxu1 %vm489_vm0, %v4412_v55 }
  0xeb   : > { %4005 = vmatpush3.bf16.msra.mxu1 %v2016_v61 }
  0xee   : > { %3959 = vmatmul.mubr.msk.bf16.gmra.mrb[56].mxu1 %vm464_vm1, %v5011_v34 }
  0xef   : > { %3962 = vmatprep.mubr.msk.bf16.mxu1 %vm464_vm1, %v5013_v37 }
  0xf6   : > { %3963 = vmatmul.mubr.msk.bf16.gmra.mrb[60].mxu1 %vm464_vm1, %v5023_v41 }
  0xf7   : > { %4006 = vmatprep.mubr.msk.bf16.mxu1 %vm464_vm1, %v4934_v7 }
  0xfe   : > { %4007 = vmatmul.mubr.msk.bf16.vlgmr.msra.gmra.mrb[64].mxu1 %vm464_vm1, %v4939_v11 }
  0xff   : > { %4010 = vmatprep.mubr.msk.bf16.mxu1 %vm464_vm1, %v4945_v15 }
 0x106   : > { %4011 = vmatmul.mubr.msk.bf16.gmra.mrb[68].mxu1 %vm464_vm1, %v4952_v21 }
 0x107   : > { %4014 = vmatprep.mubr.msk.bf16.mxu1 %vm464_vm1, %v4966_v52 }
 0x10e   : > { %4015 = vmatmul.mubr.msk.bf16.gmra.mrb[72].mxu1 %vm464_vm1, %v4969_v53 }
 0x10f   : > { %4018 = vmatprep.mubr.msk.bf16.mxu1 %vm464_vm1, %v4986_v63 }
 0x116   : > { %4019 = vmatmul.mubr.msk.bf16.gmra.mrb[76].mxu1 %vm464_vm1, %v4989_v0 }
 0x117   : > { %4086 = vmatprep.mubr.msk.bf16.mxu1 %vm464_vm1, %v4934_v7 }
 0x151   : > { %v3792_v4 = vpop.f32.mrb[0].mxu1 }
 0x152   : > { %v3768_v6 = vpop.f32.mrb[0].mxu0  ;;  %4457 = vtanh.f32 %v3792_v4  ;;  %v714_v9 = vpop.f32.mrb[1].mxu1 }
 0x153   : > { %v527_v10 = vpop.f32.mrb[1].mxu0  ;;  %4459 = vtanh.f32 %v714_v9  ;;  %v3793_v12 = vpop.f32.mrb[2].mxu1  ;;  %v536_v14 = vadd.f32 %v3768_v6, %v5105_v8 }
 0x154   : > { %v3769_v13 = vpop.f32.mrb[2].mxu0  ;;  %4461 = vtanh.f32 %v3793_v12  ;;  %v717_v16 = vpop.f32.mrb[3].mxu1  ;;  %v528_v20 = vadd.f32 %v5105_v8, %v527_v10 }
 0x155   : > { %v530_v17 = vpop.f32.mrb[3].mxu0  ;;  %v539_v18 = vadd.f32 %v3769_v13, %v5105_v8  ;;  %4463 = vtanh.f32 %v717_v16  ;;  %v592_v23 = vmul.f32 0.01, %v536_v14 }
 0x156   : > { %v531_v22 = vadd.f32 %v5105_v8, %v530_v17  ;;  %v590_v28 = vmul.f32 0.01, %v528_v20 }
 0x157   : > { %v593_v25 = vmul.f32 0.01, %v539_v18  ;;  %v5111_v36 = vmax.f32 %v536_v14, %v592_v23 }
 0x158   : > { %v591_v29 = vmul.f32 0.01, %v531_v22  ;;  %v5117_v48 = vmax.f32 %v528_v20, %v590_v28 }
 0x159   : > { %v3796_v26 = vpop.f32.mrb[4].mxu1  ;;  %v5113_v43 = vmax.f32 %v539_v18, %v593_v25 }
 0x15a   : > { %v3772_v27 = vpop.f32.mrb[4].mxu0  ;;  %4465 = vtanh.f32 %v3796_v26  ;;  %v730_v30 = vpop.f32.mrb[5].mxu1  ;;  %5685 = vst [vmem:[#allocation13_spill] sm:$0xff] %v5117_v48  ;;  %v5119_v49 = vmax.f32 %v531_v22, %v591_v29 }
 0x15b   : > { %v543_v31 = vpop.f32.mrb[5].mxu0  ;;  %4467 = vtanh.f32 %v730_v30  ;;  %v3797_v32 = vpop.f32.mrb[6].mxu1  ;;  %v552_v44 = vadd.f32 %v3772_v27, %v5105_v8 }
 0x15c   : > { %v3773_v33 = vpop.f32.mrb[6].mxu0  ;;  %v4458_v35 = vpop.eup %4457  ;;  %4469 = vtanh.f32 %v3797_v32  ;;  %5686 = vst [vmem:[#allocation14_spill] sm:$0xff] %v5119_v49  ;;  %v544_v50 = vadd.f32 %v5105_v8, %v543_v31 }
 0x15d   : > { %v733_v38 = vpop.f32.mrb[7].mxu1  ;;  %v546_v39 = vpop.f32.mrb[7].mxu0  ;;  %v555_v45 = vadd.f32 %v3773_v33, %v5105_v8  ;;  %v5124_v57 = vmul.f32 %v4458_v35, %v5111_v36  ;;  %v596_v2 = vmul.f32 0.01, %v552_v44 }
 0x15e   : > { %v4460_v40 = vpop.eup %4459  ;;  %4471 = vtanh.f32 %v733_v38  ;;  %v547_v51 = vadd.f32 %v5105_v8, %v546_v39  ;;  %v594_v9 = vmul.f32 0.01, %v544_v50 }
 0x15f   : > { %v4462_v47 = vpop.eup %4461  ;;  %v5130_v59 = vmul.f32 %v4460_v40, %v5117_v48  ;;  %v597_v3 = vmul.f32 0.01, %v555_v45  ;;  %v5144_v25 = vmax.f32 %v552_v44, %v596_v2 }
 0x160   : > { %v4464_v56 = vpop.eup %4463  ;;  %v5127_v58 = vmul.f32 %v4462_v47, %v5113_v43  ;;  %v595_v10 = vmul.f32 0.01, %v547_v51  ;;  %v5151_v29 = vmax.f32 %v544_v50, %v594_v9 }
 0x161   : > { %v5133_v60 = vmul.f32 %v4464_v56, %v5119_v49  ;;  %v3800_v4 = vpop.f32.mrb[8].mxu1  ;;  %5687 = vst [vmem:[#allocation15_spill] sm:$0xff] %v5144_v25  ;;  %v5146_v26 = vmax.f32 %v555_v45, %v597_v3 }
 0x162   : > { %v3776_v6 = vpop.f32.mrb[8].mxu0  ;;  %4473 = vtanh.f32 %v3800_v4  ;;  %v746_v12 = vpop.f32.mrb[9].mxu1  ;;  %5689 = vst [vmem:[#allocation17_spill] sm:$0xff] %v5151_v29  ;;  %v5153_v30 = vmax.f32 %v547_v51, %v595_v10 }
 0x163   : > { %v559_v13 = vpop.f32.mrb[9].mxu0  ;;  %4475 = vtanh.f32 %v746_v12  ;;  %v3801_v16 = vpop.f32.mrb[10].mxu1  ;;  %v568_v19 = vadd.f32 %v3776_v6, %v5105_v8  ;;  %5688 = vst [vmem:[#allocation16_spill] sm:$0xff] %v5146_v26 }
 0x164   : > { %v3777_v17 = vpop.f32.mrb[10].mxu0  ;;  %v4466_v18 = vpop.eup %4465  ;;  %4477 = vtanh.f32 %v3801_v16  ;;  %5690 = vst [vmem:[#allocation18_spill] sm:$0xff] %v5153_v30  ;;  %v560_v31 = vadd.f32 %v5105_v8, %v559_v13 }
 0x165   : > { %v749_v20 = vpop.f32.mrb[11].mxu1  ;;  %v562_v22 = vpop.f32.mrb[11].mxu0  ;;  %v571_v27 = vadd.f32 %v3777_v17, %v5105_v8  ;;  %v5158_v35 = vmul.f32 %v4466_v18, %v5144_v25  ;;  %v600_v44 = vmul.f32 0.01, %v568_v19 }
 0x166   : > { %v4468_v23 = vpop.eup %4467  ;;  %4479 = vtanh.f32 %v749_v20  ;;  %v563_v32 = vadd.f32 %v5105_v8, %v562_v22  ;;  %v598_v55 = vmul.f32 0.01, %v560_v31 }
 0x167   : > { %v4470_v28 = vpop.eup %4469  ;;  %v5164_v39 = vmul.f32 %v4468_v23, %v5151_v29  ;;  %v601_v45 = vmul.f32 0.01, %v571_v27  ;;  %v5173_v10 = vmax.f32 %v568_v19, %v600_v44 }
 0x168   : > { %v4472_v33 = vpop.eup %4471  ;;  %v5161_v38 = vmul.f32 %v4470_v28, %v5146_v26  ;;  %v599_v56 = vmul.f32 0.01, %v563_v32  ;;  %v5183_v19 = vmax.f32 %v560_v31, %v598_v55 }
 0x169   : > { %v5167_v40 = vmul.f32 %v4472_v33, %v5153_v30  ;;  %v3804_v47 = vpop.f32.mrb[12].mxu1  ;;  %5691 = vst [vmem:[#allocation19_spill] sm:$0xff] %v5173_v10  ;;  %v5177_v17 = vmax.f32 %v571_v27, %v601_v45 }
 0x16a   : > { %v3780_v50 = vpop.f32.mrb[12].mxu0  ;;  %4481 = vtanh.f32 %v3804_v47  ;;  %v762_v61 = vpop.f32.mrb[13].mxu1  ;;  %5693 = vst [vmem:[#allocation21_spill] sm:$0xff] %v5183_v19  ;;  %v5185_v23 = vmax.f32 %v563_v32, %v599_v56 }
 0x16b   : > { %v575_v2 = vpop.f32.mrb[13].mxu0  ;;  %4483 = vtanh.f32 %v762_v61  ;;  %v3805_v4 = vpop.f32.mrb[14].mxu1  ;;  %5692 = vst [vmem:[#allocation20_spill] sm:$0xff] %v5177_v17  ;;  %v584_v18 = vadd.f32 %v3780_v50, %v5105_v8 }
 0x16c   : > { %v3781_v6 = vpop.f32.mrb[14].mxu0  ;;  %v4474_v9 = vpop.eup %4473  ;;  %4485 = vtanh.f32 %v3805_v4  ;;  %5694 = vst [vmem:[#allocation22_spill] sm:$0xff] %v5185_v23  ;;  %v576_v28 = vadd.f32 %v5105_v8, %v575_v2 }
 0x16d   : > { %v765_v12 = vpop.f32.mrb[15].mxu1  ;;  %v578_v13 = vpop.f32.mrb[15].mxu0  ;;  %v587_v20 = vadd.f32 %v3781_v6, %v5105_v8  ;;  %v5190_v27 = vmul.f32 %v4474_v9, %v5173_v10  ;;  %v604_v31 = vmul.f32 0.01, %v584_v18 }
 0x16e   : > { %v4476_v16 = vpop.eup %4475  ;;  %4487 = vtanh.f32 %v765_v12  ;;  %v579_v33 = vadd.f32 %v5105_v8, %v578_v13  ;;  %v602_v2 = vmul.f32 0.01, %v576_v28 }
 0x16f   : > { %v4478_v22 = vpop.eup %4477  ;;  %v5196_v47 = vmul.f32 %v4476_v16, %v5183_v19  ;;  %v605_v32 = vmul.f32 0.01, %v587_v20  ;;  %v5209_v61 = vmax.f32 %v584_v18, %v604_v31 }
 0x170   : > { %v4480_v44 = vpop.eup %4479  ;;  %v5193_v45 = vmul.f32 %v4478_v22, %v5177_v17  ;;  %v603_v4 = vmul.f32 0.01, %v579_v33 }
 0x171   : > { %v5199_v50 = vmul.f32 %v4480_v44, %v5185_v23  ;;  %v3840_v55 = vpop.f32.mrb[16].mxu1  ;;  %5695 = vst [vmem:[#allocation23_spill] sm:$0xff] %v5209_v61  ;;  %v5211_v14 = vmax.f32 %v587_v20, %v605_v32 }
 0x172   : > { %v3816_v56 = vpop.f32.mrb[16].mxu0  ;;  %4489 = vtanh.f32 %v3840_v55  ;;  %v1064_v6 = vpop.f32.mrb[17].mxu1 }
 0x173   : > { %v901_v9 = vpop.f32.mrb[17].mxu0  ;;  %v910_v13 = vadd.f32 %v3816_v56, %v5105_v8  ;;  %4491 = vtanh.f32 %v1064_v6  ;;  %v3841_v16 = vpop.f32.mrb[18].mxu1  ;;  %5696 = vst [vmem:[#allocation24_spill] sm:$0xff] %v5211_v14  ;;  %v5216_v6 = vmax.f32 %v576_v28, %v602_v2 }
 0x174   : > { %v3817_v22 = vpop.f32.mrb[18].mxu0  ;;  %v4482_v44 = vpop.eup %4481  ;;  %v902_v51 = vadd.f32 %v5105_v8, %v901_v9  ;;  %4493 = vtanh.f32 %v3841_v16  ;;  %v5218_v9 = vmax.f32 %v579_v33, %v603_v4 }
 0x175   : > { %v1067_v3 = vpop.f32.mrb[19].mxu1  ;;  %v904_v62 = vpop.f32.mrb[19].mxu0  ;;  %v913_v12 = vadd.f32 %v3817_v22, %v5105_v8  ;;  %5697 = vst [vmem:[#allocation25_spill] sm:$0xff] %v5216_v6  ;;  %v5222_v19 = vmul.f32 %v4482_v44, %v5209_v61  ;;  %v966_v20 = vmul.f32 0.01, %v910_v13 }
 0x176   : > { %v4484_v55 = vpop.eup %4483  ;;  %4495 = vtanh.f32 %v1067_v3  ;;  %5698 = vst [vmem:[#allocation26_spill] sm:$0xff] %v5218_v9  ;;  %v905_v16 = vadd.f32 %v5105_v8, %v904_v62  ;;  %v964_v28 = vmul.f32 0.01, %v902_v51 }
 0x177   : > { %v4486_v56 = vpop.eup %4485  ;;  %v5228_v3 = vmul.f32 %v4484_v55, %v5216_v6  ;;  %v967_v32 = vmul.f32 0.01, %v913_v12 }
 0x178   : > { %v4488_v23 = vpop.eup %4487  ;;  %v5225_v18 = vmul.f32 %v4486_v56, %v5211_v14  ;;  %v965_v4 = vmul.f32 0.01, %v905_v16  ;;  %v982_v14 = vmax.f32 %v910_v13, %v966_v20  ;;  %v980_v61 = vmax.f32 %v902_v51, %v964_v28 }
 0x179   : > { %v5231_v31 = vmul.f32 %v4488_v23, %v5218_v9  ;;  %v3844_v33 = vpop.f32.mrb[20].mxu1  ;;  %v983_v29 = vmax.f32 %v913_v12, %v967_v32 }
 0x17a   : > { %v3820_v2 = vpop.f32.mrb[20].mxu0  ;;  %4497 = vtanh.f32 %v3844_v33  ;;  %v1080_v22 = vpop.f32.mrb[21].mxu1  ;;  %v981_v51 = vmax.f32 %v905_v16, %v965_v4  ;;  %v4390_v4 = vld [vmem:[#allocation7 + $0x8] sm:$0xff]  }
 0x17b   : > { %v917_v44 = vpop.f32.mrb[21].mxu0  ;;  %v926_v55 = vadd.f32 %v3820_v2, %v5105_v8  ;;  %4499 = vtanh.f32 %v1080_v22  ;;  %v3845_v23 = vpop.f32.mrb[22].mxu1 }
 0x17c   : > { %v3821_v9 = vpop.f32.mrb[22].mxu0  ;;  %v4490_v6 = vpop.eup %4489  ;;  %v918_v17 = vadd.f32 %v5105_v8, %v917_v44  ;;  %4501 = vtanh.f32 %v3845_v23 }
 0x17d   : > { %v1083_v10 = vpop.f32.mrb[23].mxu1  ;;  %v920_v62 = vpop.f32.mrb[23].mxu0  ;;  %v1145_v30 = vmul.f32 %v4490_v6, %v982_v14  ;;  %v929_v13 = vadd.f32 %v3821_v9, %v5105_v8  ;;  %v970_v23 = vmul.f32 0.01, %v926_v55 }
 0x17e   : > { %v4492_v33 = vpop.eup %4491  ;;  %4503 = vtanh.f32 %v1083_v10  ;;  %v921_v28 = vadd.f32 %v5105_v8, %v920_v62  ;;  %v968_v26 = vmul.f32 0.01, %v918_v17 }
 0x17f   : > { %v4494_v20 = vpop.eup %4493  ;;  %v1143_v2 = vmul.f32 %v4492_v33, %v980_v61  ;;  %v971_v49 = vmul.f32 0.01, %v929_v13  ;;  %v986_v7 = vmax.f32 %v926_v55, %v970_v23 }
 0x180   : > { %v4496_v22 = vpop.eup %4495  ;;  %v1146_v44 = vmul.f32 %v4494_v20, %v983_v29  ;;  %v969_v6 = vmul.f32 0.01, %v921_v28  ;;  %v984_v33 = vmax.f32 %v918_v17, %v968_v26 }
 0x181   : > { %v1144_v56 = vmul.f32 %v4496_v22, %v981_v51  ;;  %v3848_v14 = vpop.f32.mrb[24].mxu1 }
 0x182   : > { %v1160_v25 = vpack.c.bf16 %v1146_v44, %v1145_v30  ;;  %v3824_v12 = vpop.f32.mrb[24].mxu0  ;;  %4505 = vtanh.f32 %v3848_v14  ;;  %v1096_v10 = vpop.f32.mrb[25].mxu1  ;;  %v987_v14 = vmax.f32 %v929_v13, %v971_v49  ;;  %v985_v23 = vmax.f32 %v921_v28, %v969_v6 }
 0x183   : > { %v933_v9 = vpop.f32.mrb[25].mxu0  ;;  %v1159_v32 = vpack.c.bf16 %v1144_v56, %v1143_v2  ;;  %v942_v61 = vadd.f32 %v3824_v12, %v5105_v8  ;;  %4507 = vtanh.f32 %v1096_v10  ;;  %v3849_v16 = vpop.f32.mrb[26].mxu1 }
 0x184   : > { %v3825_v62 = vpop.f32.mrb[26].mxu0  ;;  %v4498_v29 = vpop.eup %4497  ;;  %v934_v20 = vadd.f32 %v5105_v8, %v933_v9  ;;  %4509 = vtanh.f32 %v3849_v16  ;;  %v4391_v9 = vld [vmem:[#allocation7 + $0x10] sm:$0xff]  }
 0x185   : > { %v1099_v30 = vpop.f32.mrb[27].mxu1  ;;  %3870 = vmatprep.mubr.bf16.mxu0 %v1159_v32  ;;  %v936_v51 = vpop.f32.mrb[27].mxu0  ;;  %v1149_v44 = vmul.f32 %v4498_v29, %v986_v7  ;;  %v945_v56 = vadd.f32 %v3825_v62, %v5105_v8  ;;  %v974_v10 = vmul.f32 0.01, %v942_v61 }
 0x186   : > { %v4500_v22 = vpop.eup %4499  ;;  %4511 = vtanh.f32 %v1099_v30  ;;  %3871 = vmatmul.mubr.bf16.vlgmr.msra.gmra.mrb[32].mxu0 %v1160_v25  ;;  %v937_v12 = vadd.f32 %v5105_v8, %v936_v51  ;;  %v972_v16 = vmul.f32 0.01, %v934_v20 }
 0x187   : > { %v4502_v55 = vpop.eup %4501  ;;  %v1147_v2 = vmul.f32 %v4500_v22, %v984_v33  ;;  %3887 = vmatpush3.bf16.msra.mxu0 %v5099_v1  ;;  %v975_v7 = vmul.f32 0.01, %v945_v56  ;;  %v990_v33 = vmax.f32 %v942_v61, %v974_v10  ;;  %v4392_v22 = vld [vmem:[#allocation7 + $0x18] sm:$0xff]  }
 0x188   : > { %v4504_v26 = vpop.eup %4503  ;;  %v1150_v17 = vmul.f32 %v4502_v55, %v987_v14  ;;  %3888 = vmatprep.subr.bf16.mxu0 %v4390_v4  ;;  %v973_v29 = vmul.f32 0.01, %v937_v12  ;;  %v988_v55 = vmax.f32 %v934_v20, %v972_v16 }
 0x189   : > { %v1148_v32 = vmul.f32 %v4504_v26, %v985_v23  ;;  %v3852_v49 = vpop.f32.mrb[28].mxu1 }
 0x18a   : > { %v3828_v13 = vpop.f32.mrb[28].mxu0  ;;  %v1162_v62 = vpack.c.bf16 %v1150_v17, %v1149_v44  ;;  %4513 = vtanh.f32 %v3852_v49  ;;  %v1112_v25 = vpop.f32.mrb[29].mxu1  ;;  %v991_v49 = vmax.f32 %v945_v56, %v975_v7 }
 0x18b   : > { %3889 = vmatpush3.bf16.msra.mxu0 %v4390_v4  ;;  %v949_v28 = vpop.f32.mrb[29].mxu0  ;;  %v1161_v6 = vpack.c.bf16 %v1148_v32, %v1147_v2  ;;  %v958_v1 = vadd.f32 %v3828_v13, %v5105_v8  ;;  %4515 = vtanh.f32 %v1112_v25  ;;  %v3853_v30 = vpop.f32.mrb[30].mxu1  ;;  %v989_v32 = vmax.f32 %v937_v12, %v973_v29 }
 0x18c   : > { %v3829_v51 = vpop.f32.mrb[30].mxu0  ;;  %3890 = vmatprep.subr.bf16.mxu0 %v4391_v9  ;;  %v4506_v14 = vpop.eup %4505  ;;  %v950_v23 = vadd.f32 %v5105_v8, %v949_v28  ;;  %4517 = vtanh.f32 %v3853_v30  ;;  %v4393_v28 = vld [vmem:[#allocation7 + $0x20] sm:$0xff]  }
 0x18d   : > { %v1115_v44 = vpop.f32.mrb[31].mxu1  ;;  %3874 = vmatprep.mubr.bf16.mxu0 %v1161_v6  ;;  %v952_v26 = vpop.f32.mrb[31].mxu0  ;;  %v1153_v4 = vmul.f32 %v4506_v14, %v990_v33  ;;  %v961_v61 = vadd.f32 %v3829_v51, %v5105_v8  ;;  %v978_v25 = vmul.f32 0.01, %v958_v1 }
 0x18e   : > { %v4508_v17 = vpop.eup %4507  ;;  %4519 = vtanh.f32 %v1115_v44  ;;  %3875 = vmatmul.mubr.bf16.gmra.mrb[36].mxu0 %v1162_v62  ;;  %v953_v13 = vadd.f32 %v5105_v8, %v952_v26  ;;  %v976_v30 = vmul.f32 0.01, %v950_v23 }
 0x18f   : > { %v4510_v2 = vpop.eup %4509  ;;  %v1151_v10 = vmul.f32 %v4508_v17, %v988_v55  ;;  %3891 = vmatpush3.bf16.msra.mxu0 %v4391_v9  ;;  %v979_v48 = vmul.f32 0.01, %v961_v61  ;;  %v994_v12 = vmax.f32 %v958_v1, %v978_v25  ;;  %v4394_v9 = vld [vmem:[#allocation7 + $0x28] sm:$0xff]   ;;  %v4395_v1 = vld [vmem:[#allocation7 + $0x30] sm:$0xff]  }
 0x190   : > { %v4512_v20 = vpop.eup %4511  ;;  %v1154_v16 = vmul.f32 %v4510_v2, %v991_v49  ;;  %3892 = vmatprep.subr.bf16.mxu0 %v4392_v22  ;;  %v977_v7 = vmul.f32 0.01, %v953_v13  ;;  %v992_v55 = vmax.f32 %v950_v23, %v976_v30 }
 0x191   : > { %v1152_v6 = vmul.f32 %v4512_v20, %v989_v32  ;;  %v5254_v33 = vpop.f32.mrb[32].mxu1  ;;  %v995_v49 = vmax.f32 %v961_v61, %v979_v48  ;;  %v4396_v48 = vld [vmem:[#allocation7 + $0x38] sm:$0xff]  }
 0x192   : > { %v1164_v56 = vpack.c.bf16 %v1154_v16, %v1153_v4  ;;  %v5256_v62 = vpop.f32.mrb[33].mxu1 }
 0x193   : > { %3893 = vmatpush3.bf16.msra.mxu0 %v4392_v22  ;;  %v1163_v51 = vpack.c.bf16 %v1152_v6, %v1151_v10  ;;  %v5258_v29 = vpop.f32.mrb[34].mxu1  ;;  %v993_v22 = vmax.f32 %v953_v13, %v977_v7  ;;  %v5699_v13 = vpack.c.bf16 %v5133_v60, %v5130_v59  ;;  %v5701_v59 = vpack.c.bf16 %v5167_v40, %v5164_v39  ;;  %v4399_v60 = vld [vmem:[#allocation7 + $0x90] sm:$0xff]   ;;  %v4401_v39 = vld [vmem:[#allocation7 + $0xa0] sm:$0xff]  }
 0x194   : > { %3894 = vmatprep.subr.bf16.mxu0 %v4393_v28  ;;  %v4514_v14 = vpop.eup %4513  ;;  %v5260_v44 = vpop.f32.mrb[35].mxu1 }
 0x195   : > { %3878 = vmatprep.mubr.bf16.mxu0 %v1163_v51  ;;  %v4516_v26 = vpop.eup %4515  ;;  %v1157_v17 = vmul.f32 %v4514_v14, %v994_v12  ;;  %v4398_v12 = vld [vmem:[#allocation7 + $0x88] sm:$0xff]   ;;  %v5700_v14 = vpack.c.bf16 %v5127_v58, %v5124_v57  ;;  %v5702_v57 = vpack.c.bf16 %v5161_v38, %v5158_v35  ;;  %v5703_v58 = vpack.c.bf16 %v5199_v50, %v5196_v47 }
 0x196   : > { %3879 = vmatmul.mubr.bf16.gmra.mrb[40].mxu0 %v1164_v56  ;;  %v4518_v4 = vpop.eup %4517  ;;  %v1155_v2 = vmul.f32 %v4516_v26, %v992_v55  ;;  %v1542_v35 = vadd.f32 %v5105_v8, %v5256_v62  ;;  %v1553_v47 = vadd.f32 %v5258_v29, %v5105_v8  ;;  %v5704_v50 = vpack.c.bf16 %v5193_v45, %v5190_v27  ;;  %v4403_v62 = vld [vmem:[#allocation7 + $0xb0] sm:$0xff]  }
 0x197   : > { %3895 = vmatpush3.bf16.msra.mxu0 %v4393_v28  ;;  %v1158_v10 = vmul.f32 %v4518_v4, %v995_v49  ;;  %v4397_v28 = vld [vmem:[#allocation7 + $0x80] sm:$0xff]   ;;  %v4400_v49 = vld [vmem:[#allocation7 + $0x98] sm:$0xff]  }
 0x198   : > { %v4520_v32 = vpop.eup %4519  ;;  %3896 = vmatprep.subr.bf16.mxu0 %v4394_v9 }
 0x199   : > { %v1156_v20 = vmul.f32 %v4520_v32, %v993_v22  ;;  %v5262_v16 = vpop.f32.mrb[36].mxu1  ;;  %v1166_v25 = vpack.c.bf16 %v1158_v10, %v1157_v17  ;;  %v1550_v22 = vadd.f32 %v5254_v33, %v5105_v8  ;;  %v4402_v10 = vld [vmem:[#allocation7 + $0xa8] sm:$0xff]   ;;  %v1545_v33 = vadd.f32 %v5105_v8, %v5260_v44 }
 0x19a   : > { %v5264_v23 = vpop.f32.mrb[37].mxu1  ;;  %v1566_v45 = vadd.f32 %v5262_v16, %v5105_v8  ;;  %v5706_v16 = vpack.c.bf16 %v5225_v18, %v5222_v19 }
 0x19b   : > { %3897 = vmatpush3.bf16.msra.mxu0 %v4394_v9  ;;  %v1165_v6 = vpack.c.bf16 %v1156_v20, %v1155_v2  ;;  %v5266_v30 = vpop.f32.mrb[38].mxu1  ;;  %v1606_v20 = vmul.f32 0.01, %v1550_v22  ;;  %v1605_v29 = vmul.f32 0.01, %v1545_v33 }
 0x19c   : > { %3898 = vmatprep.subr.bf16.mxu0 %v4395_v1  ;;  %v5268_v61 = vpop.f32.mrb[39].mxu1 }
 0x19d   : > { %3882 = vmatprep.mubr.bf16.mxu0 %v1165_v6  ;;  %v1607_v6 = vmul.f32 0.01, %v1553_v47  ;;  %v1622_v27 = vmax.f32 %v1550_v22, %v1606_v20  ;;  %v1610_v22 = vmul.f32 0.01, %v1566_v45 }
 0x19e   : > { %3883 = vmatmul.mubr.bf16.gmra.mrb[44].mxu0 %v1166_v25  ;;  %v1604_v25 = vmul.f32 0.01, %v1542_v35 }
 0x19f   : > { %3899 = vmatpush3.bf16.msra.mxu0 %v4395_v1  ;;  %3902 = vmatprep.mubr.bf16.mxu0 %v5699_v13  ;;  %v5705_v1 = vpack.c.bf16 %v5231_v31, %v5228_v3  ;;  %v4404_v3 = vld [vmem:[#allocation7 + $0xb8] sm:$0xff]  }
 0x1a0   : > { %3900 = vmatprep.subr.bf16.mxu0 %v4396_v48 }
 0x1a1   : > { %v5273_v56 = vpop.f32.mrb[40].mxu1 }
 0x1a2   : > { %v5275_v7 = vpop.f32.mrb[41].mxu1 }
 0x1a3   : > { %3901 = vmatpush3.bf16.msra.mxu0 %v4396_v48  ;;  %v5277_v51 = vpop.f32.mrb[42].mxu1 }
 0x1a4   : > { %3966 = vmatprep.subr.bf16.mxu0 %v4397_v28  ;;  %v5279_v9 = vpop.f32.mrb[43].mxu1 }
 0x1a6   : > { %3903 = vmatmul.mubr.bf16.vlgmr.msra.gmra.mrb[32].mxu0 %v5700_v14 }
 0x1a7   : > { %3906 = vmatprep.mubr.bf16.mxu0 %v5701_v59  ;;  %3967 = vmatpush3.bf16.msra.mxu0 %v4397_v28  ;;  %v1620_v28 = vmax.f32 %v1542_v35, %v1604_v25 }
 0x1a8   : > { %3968 = vmatprep.subr.bf16.mxu0 %v4398_v12 }
 0x1a9   : > { %v5287_v55 = vpop.f32.mrb[44].mxu1 }
 0x1aa   : > { %v5289_v26 = vpop.f32.mrb[45].mxu1 }
 0x1ab   : > { %3969 = vmatpush3.bf16.msra.mxu0 %v4398_v12  ;;  %v5291_v17 = vpop.f32.mrb[46].mxu1  ;;  %v1558_v12 = vadd.f32 %v5105_v8, %v5264_v23 }
 0x1ac   : > { %3970 = vmatprep.subr.bf16.mxu0 %v4399_v60  ;;  %v5293_v4 = vpop.f32.mrb[47].mxu1 }
 0x1ad   : > { %v1608_v35 = vmul.f32 0.01, %v1558_v12 }
 0x1ae   : > { %3907 = vmatmul.mubr.bf16.gmra.mrb[36].mxu0 %v5702_v57 }
 0x1af   : > { %3910 = vmatprep.mubr.bf16.mxu0 %v5703_v58  ;;  %3971 = vmatpush3.bf16.msra.mxu0 %v4399_v60  ;;  %v1623_v60 = vmax.f32 %v1553_v47, %v1607_v6  ;;  %v1624_v6 = vmax.f32 %v1558_v12, %v1608_v35  ;;  %v1590_v35 = vadd.f32 %v5105_v8, %v5289_v26 }
 0x1b0   : > { %3972 = vmatprep.subr.bf16.mxu0 %v4400_v49 }
 0x1b1   : > { %v3952_v40 = vpop.f32.mrb[48].mxu1 }
 0x1b2   : > { %4521 = vtanh.f32 %v3952_v40  ;;  %v1704_v2 = vpop.f32.mrb[49].mxu1  ;;  %v1561_v40 = vadd.f32 %v5105_v8, %v5268_v61  ;;  %v1582_v61 = vadd.f32 %v5273_v56, %v5105_v8 }
 0x1b3   : > { %3973 = vmatpush3.bf16.msra.mxu0 %v4400_v49  ;;  %4523 = vtanh.f32 %v1704_v2  ;;  %v3953_v32 = vpop.f32.mrb[50].mxu1  ;;  %v1569_v49 = vadd.f32 %v5266_v30, %v5105_v8 }
 0x1b4   : > { %3974 = vmatprep.subr.bf16.mxu0 %v4401_v39  ;;  %4525 = vtanh.f32 %v3953_v32  ;;  %v1707_v38 = vpop.f32.mrb[51].mxu1 }
 0x1b5   : > { %4527 = vtanh.f32 %v1707_v38  ;;  %v1611_v38 = vmul.f32 0.01, %v1569_v49 }
 0x1b6   : > { %3911 = vmatmul.mubr.bf16.gmra.mrb[40].mxu0 %v5704_v50 }
 0x1b7   : > { %3914 = vmatprep.mubr.bf16.mxu0 %v5705_v1  ;;  %3975 = vmatpush3.bf16.msra.mxu0 %v4401_v39  ;;  %v1621_v39 = vmax.f32 %v1545_v33, %v1605_v29  ;;  %v1609_v1 = vmul.f32 0.01, %v1561_v40  ;;  %v1626_v33 = vmax.f32 %v1566_v45, %v1610_v22  ;;  %v1585_v45 = vadd.f32 %v5277_v51, %v5105_v8  ;;  %v4411_v22 = vld [vmem:[#allocation5 + $0x6c] ss:$16 sps:$4 sm:$0x3f]  }
 0x1b8   : > { %3976 = vmatprep.subr.bf16.mxu0 %v4402_v10 }
 0x1b9   : > { %v3956_v48 = vpop.f32.mrb[52].mxu1 }
 0x1ba   : > { %4529 = vtanh.f32 %v3956_v48  ;;  %v1720_v13 = vpop.f32.mrb[53].mxu1  ;;  %v1574_v48 = vadd.f32 %v5105_v8, %v5275_v7  ;;  %v1614_v7 = vmul.f32 0.01, %v1582_v61 }
 0x1bb   : > { %3977 = vmatpush3.bf16.msra.mxu0 %v4402_v10  ;;  %4531 = vtanh.f32 %v1720_v13  ;;  %v3957_v44 = vpop.f32.mrb[54].mxu1  ;;  %v4405_v10 = vld [vmem:[#allocation5 + $0xc] ss:$16 sps:$4 sm:$0xff]  }
 0x1bc   : > { %3978 = vmatprep.subr.bf16.mxu0 %v4403_v62  ;;  %v4522_v31 = vpop.eup %4521  ;;  %4533 = vtanh.f32 %v3957_v44  ;;  %v1723_v14 = vpop.f32.mrb[55].mxu1 }
 0x1bd   : > { %v4524_v59 = vpop.eup %4523  ;;  %v1785_v57 = vmul.f32 %v4522_v31, %v1622_v27  ;;  %4535 = vtanh.f32 %v1723_v14  ;;  %v1627_v27 = vmax.f32 %v1569_v49, %v1611_v38  ;;  %v1577_v31 = vadd.f32 %v5105_v8, %v5279_v9 }
 0x1be   : > { %3915 = vmatmul.mubr.bf16.gmra.mrb[44].mxu0 %v5706_v16  ;;  %v4526_v58 = vpop.eup %4525  ;;  %v1783_v23 = vmul.f32 %v4524_v59, %v1620_v28  ;;  %v4409_v59 = vld [vmem:[#allocation5 + $0x4c] ss:$16 sps:$4 sm:$0xff]   ;;  %v1598_v9 = vadd.f32 %v5287_v55, %v5105_v8 }
 0x1bf   : > { %3979 = vmatpush3.bf16.msra.mxu0 %v4403_v62  ;;  %v4528_v2 = vpop.eup %4527  ;;  %v1786_v32 = vmul.f32 %v4526_v58, %v1623_v60  ;;  %v4407_v62 = vld [vmem:[#allocation5 + $0x2c] ss:$16 sps:$4 sm:$0xff]   ;;  %v1612_v60 = vmul.f32 0.01, %v1574_v48  ;;  %v1613_v58 = vmul.f32 0.01, %v1577_v31 }
 0x1c0   : > { %3980 = vmatprep.subr.bf16.mxu0 %v4404_v3  ;;  %v1784_v30 = vmul.f32 %v4528_v2, %v1621_v39  ;;  %v1618_v26 = vmul.f32 0.01, %v1598_v9 }
 0x1c1   : > { %v3960_v47 = vpop.f32.mrb[56].mxu1  ;;  %v1800_v50 = vpack.c.bf16 %v1786_v32, %v1785_v57  ;;  %v1615_v57 = vmul.f32 0.01, %v1585_v45 }
 0x1c2   : > { %4537 = vtanh.f32 %v3960_v47  ;;  %v1736_v19 = vpop.f32.mrb[57].mxu1  ;;  %v1799_v18 = vpack.c.bf16 %v1784_v30, %v1783_v23 }
 0x1c3   : > { %3981 = vmatpush3.bf16.msra.mxu0 %v4404_v3  ;;  %4539 = vtanh.f32 %v1736_v19  ;;  %v3961_v20 = vpop.f32.mrb[58].mxu1  ;;  %v1625_v3 = vmax.f32 %v1561_v40, %v1609_v1  ;;  %v1630_v40 = vmax.f32 %v1582_v61, %v1614_v7  ;;  %v1631_v47 = vmax.f32 %v1585_v45, %v1615_v57  ;;  %v4414_v57 = vld [vmem:[#allocation7 + $0xc8] sm:$0xff]  }
 0x1c4   : > { %4022 = vmatprep.subr.bf16.mxu0 %v4405_v10  ;;  %v4530_v25 = vpop.eup %4529  ;;  %4541 = vtanh.f32 %v3961_v20  ;;  %v1739_v29 = vpop.f32.mrb[59].mxu1  ;;  %3982 = vmatprep.mubr.bf16.mxu0 %v1799_v18  ;;  %v1629_v19 = vmax.f32 %v1577_v31, %v1613_v58  ;;  %v1593_v18 = vadd.f32 %v5105_v8, %v5293_v4  ;;  %v1634_v45 = vmax.f32 %v1598_v9, %v1618_v26  ;;  %v4428_v26 = vld [vmem:[%s5652_s4 + $0x48] ss:$12 sps:$4 sm:$0xff]  }
 0x1c5   : > { %v4532_v13 = vpop.eup %4531  ;;  %4543 = vtanh.f32 %v1739_v29  ;;  %v1789_v56 = vmul.f32 %v4530_v25, %v1626_v33  ;;  %v4413_v25 = vld [vmem:[#allocation7 + $0xc0] sm:$0xff]  }
 0x1c6   : > { %3983 = vmatmul.mubr.bf16.vlgmr.msra.gmra.mrb[32].mxu0 %v1800_v50  ;;  %v4534_v44 = vpop.eup %4533  ;;  %v1787_v28 = vmul.f32 %v4532_v13, %v1624_v6  ;;  %v1601_v50 = vadd.f32 %v5291_v17, %v5105_v8  ;;  %v1616_v6 = vmul.f32 0.01, %v1590_v35  ;;  %v1617_v13 = vmul.f32 0.01, %v1593_v18 }
 0x1c7   : > { %4023 = vmatpush3.bf16.msra.mxu0 %v4405_v10  ;;  %v4536_v12 = vpop.eup %4535  ;;  %v1790_v14 = vmul.f32 %v4534_v44, %v1627_v27  ;;  %v1628_v10 = vmax.f32 %v1574_v48, %v1612_v60 }
 0x1c8   : > { %4024 = vmatprep.subr.bf16.mxu0 %v4407_v62  ;;  %v1788_v49 = vmul.f32 %v4536_v12, %v1625_v3  ;;  %v1619_v48 = vmul.f32 0.01, %v1601_v50  ;;  %v1632_v4 = vmax.f32 %v1590_v35, %v1616_v6 }
 0x1c9   : > { %v3964_v16 = vpop.f32.mrb[60].mxu1  ;;  %v1802_v51 = vpack.c.bf16 %v1790_v14, %v1789_v56 }
 0x1ca   : > { %4545 = vtanh.f32 %v3964_v16  ;;  %v1752_v39 = vpop.f32.mrb[61].mxu1  ;;  %v1801_v23 = vpack.c.bf16 %v1788_v49, %v1787_v28  ;;  %v1635_v44 = vmax.f32 %v1601_v50, %v1619_v48  ;;  %v1633_v28 = vmax.f32 %v1593_v18, %v1617_v13  ;;  %v4415_v16 = vld [vmem:[#allocation7 + $0xd0] sm:$0xff]   ;;  %v4422_v50 = vld [vmem:[#allocation2 + $0x38] ss:$20 sps:$4 sm:$0xff]  }
 0x1cb   : > { %4025 = vmatpush3.bf16.msra.mxu0 %v4407_v62  ;;  %4547 = vtanh.f32 %v1752_v39  ;;  %v3965_v2 = vpop.f32.mrb[62].mxu1  ;;  %v2179_v62 = vsel %vm489_vm0, %v4411_v22, 0  ;;  %v4419_v39 = vld [vmem:[#allocation7 + $0xf0] sm:$0xff]   ;;  %v4425_v18 = vld [vmem:[%s5652_s4] ss:$12 sps:$4 sm:$0xff]  }
 0x1cc   : > { %4026 = vmatprep.subr.bf16.mxu0 %v4409_v59  ;;  %v4538_v32 = vpop.eup %4537  ;;  %4549 = vtanh.f32 %v3965_v2  ;;  %v1755_v30 = vpop.f32.mrb[63].mxu1  ;;  %3986 = vmatprep.mubr.bf16.mxu0 %v1801_v23 }
 0x1cd   : > { %v4540_v38 = vpop.eup %4539  ;;  %4551 = vtanh.f32 %v1755_v30  ;;  %v1793_v55 = vmul.f32 %v4538_v32, %v1630_v40  ;;  %v4420_v40 = vld [vmem:[#allocation7 + $0xf8] sm:$0xff]  }
 0x1ce   : > { %3987 = vmatmul.mubr.bf16.gmra.mrb[36].mxu0 %v1802_v51  ;;  %v4542_v1 = vpop.eup %4541  ;;  %v1791_v33 = vmul.f32 %v4540_v38, %v1628_v10 }
 0x1cf   : > { %4027 = vmatpush3.bf16.msra.mxu0 %v4409_v59  ;;  %v4544_v61 = vpop.eup %4543  ;;  %v1794_v20 = vmul.f32 %v4542_v1, %v1631_v47  ;;  %v4421_v47 = vld [vmem:[#allocation2 + $0x10] ss:$20 sps:$4 sm:$0xff]   ;;  %v4424_v1 = vld [vmem:[#allocation2 + $0x88] ss:$20 sps:$4 sm:$0x3f]  }
 0x1d0   : > { %4269 = vmatprep.subr.msk.bf16.mxu0 %vm489_vm0, %v4411_v22  ;;  %v1792_v17 = vmul.f32 %v4544_v61, %v1629_v19  ;;  %4078 = vmatprep.subr.bf16.mxu1 %v4421_v47  ;;  %v2527_v19 = vsel %vm489_vm0, %v4424_v1, 0  ;;  %v4427_v61 = vld [vmem:[%s5652_s4 + $0x30] ss:$12 sps:$4 sm:$0xff]  }
 0x1d1   : > { %v1804_v29 = vpack.c.bf16 %v1794_v20, %v1793_v55  ;;  %4079 = vmatpush3.bf16.msra.mxu1 %v4421_v47  ;;  %v4423_v55 = vld [vmem:[#allocation2 + $0x60] ss:$20 sps:$4 sm:$0xff]  }
 0x1d2   : > { %v1803_v27 = vpack.c.bf16 %v1792_v17, %v1791_v33  ;;  %4080 = vmatprep.subr.bf16.mxu1 %v4422_v50  ;;  %v4426_v33 = vld [vmem:[%s5652_s4 + $0x18] ss:$12 sps:$4 sm:$0xff]  }
 0x1d3   : > { %4029 = vmatpush3.bf16.msra.mxu0 %v2179_v62 }
 0x1d4   : > { %4046 = vmatprep.subr.bf16.mxu0 %v4413_v25  ;;  %v4546_v8 = vpop.eup %4545  ;;  %3990 = vmatprep.mubr.bf16.mxu0 %v1803_v27 }
 0x1d5   : > { %v4548_v56 = vpop.eup %4547  ;;  %v1797_v3 = vmul.f32 %v4546_v8, %v1634_v45  ;;  %4081 = vmatpush3.bf16.msra.mxu1 %v4422_v50 }
 0x1d6   : > { %3991 = vmatmul.mubr.bf16.gmra.mrb[40].mxu0 %v1804_v29  ;;  %v4550_v31 = vpop.eup %4549  ;;  %v1795_v12 = vmul.f32 %v4548_v56, %v1632_v4  ;;  %4082 = vmatprep.subr.bf16.mxu1 %v4423_v55 }
 0x1d7   : > { %v4552_v7 = vpop.eup %4551  ;;  %v1798_v14 = vmul.f32 %v4550_v31, %v1635_v44 }
 0x1d8   : > { %v1796_v59 = vmul.f32 %v4552_v7, %v1633_v28 }
 0x1d9   : > { %v1806_v60 = vpack.c.bf16 %v1798_v14, %v1797_v3  ;;  %4083 = vmatpush3.bf16.msra.mxu1 %v4423_v55 }
 0x1da   : > { %v1805_v49 = vpack.c.bf16 %v1796_v59, %v1795_v12  ;;  %4270 = vmatprep.subr.msk.bf16.mxu1 %vm489_vm0, %v4424_v1 }
 0x1dc   : > { %3994 = vmatprep.mubr.bf16.mxu0 %v1805_v49 }
 0x1dd   : > { %4085 = vmatpush3.bf16.msra.mxu1 %v2527_v19 }
 0x1de   : > { %3995 = vmatmul.mubr.bf16.gmra.mrb[44].mxu0 %v1806_v60  ;;  %4102 = vmatprep.subr.bf16.mxu1 %v4425_v18 }
 0x1df   : > { %4030 = vmatprep.mubr.msk.bf16.mxu0 %vm464_vm1, %v4959_v42  ;;  %v4416_v42 = vld [vmem:[#allocation7 + $0xd8] sm:$0xff]  }
 0x1e0   : > { %4087 = vmatmul.mubr.msk.bf16.vlgmr.msra.gmra.mrb[80].mxu1 %vm464_vm1, %v4939_v11  ;;  %v4429_v11 = vld [vmem:[%s5652_s4 + $0x60] ss:$12 sps:$4 sm:$0xff]  }
 0x1e1   : > { %4103 = vmatpush3.bf16.msra.mxu1 %v4425_v18  ;;  %4090 = vmatprep.mubr.msk.bf16.mxu1 %vm464_vm1, %v4945_v15 }
 0x1e2   : > { %4104 = vmatprep.subr.bf16.mxu1 %v4426_v33 }
 0x1e5   : > { %4105 = vmatpush3.bf16.msra.mxu1 %v4426_v33 }
 0x1e6   : > { %4031 = vmatmul.mubr.msk.bf16.vlgmr.msra.gmra.mrb[48].mxu0 %vm464_vm1, %v4961_v46  ;;  %v5360_v46 = vpop.f32.mrb[64].mxu1  ;;  %4106 = vmatprep.subr.bf16.mxu1 %v4427_v61 }
 0x1e7   : > { %4034 = vmatprep.mubr.msk.bf16.mxu0 %vm464_vm1, %v4975_v54  ;;  %4047 = vmatpush3.bf16.msra.mxu0 %v4413_v25  ;;  %v5362_v54 = vpop.f32.mrb[65].mxu1 }
 0x1e8   : > { %4048 = vmatprep.subr.bf16.mxu0 %v4414_v57  ;;  %4091 = vmatmul.mubr.msk.bf16.gmra.mrb[84].mxu1 %vm464_vm1, %v4952_v21 }
 0x1e9   : > { %4107 = vmatpush3.bf16.msra.mxu1 %v4427_v61  ;;  %4094 = vmatprep.mubr.msk.bf16.mxu1 %vm464_vm1, %v4966_v52  ;;  %v5426_v52 = vld [vmem:[%s5653_s5] ss:$0 sm:$0xff] }
 0x1ea   : > { %4108 = vmatprep.subr.bf16.mxu1 %v4428_v26  ;;  %v2061_v20 = vadd.f32 %v5426_v52, %v5360_v46  ;;  %v2053_v62 = vadd.f32 %v5426_v52, %v5362_v54 }
 0x1eb   : > { %4049 = vmatpush3.bf16.msra.mxu0 %v4414_v57 }
 0x1ec   : > { %4050 = vmatprep.subr.bf16.mxu0 %v4415_v16  ;;  %v2117_v6 = vmul.f32 0.01, %v2061_v20  ;;  %v2115_v17 = vmul.f32 0.01, %v2053_v62 }
 0x1ed   : > { %4109 = vmatpush3.bf16.msra.mxu1 %v4428_v26 }
 0x1ee   : > { %4035 = vmatmul.mubr.msk.bf16.gmra.mrb[52].mxu0 %vm464_vm1, %v4993_v5  ;;  %v5364_v5 = vpop.f32.mrb[66].mxu1  ;;  %4110 = vmatprep.subr.bf16.mxu1 %v4429_v11  ;;  %v2133_v45 = vmax.f32 %v2061_v20, %v2117_v6  ;;  %v2131_v44 = vmax.f32 %v2053_v62, %v2115_v17 }
 0x1ef   : > { %4038 = vmatprep.mubr.msk.bf16.mxu0 %vm464_vm1, %v5001_v24  ;;  %4051 = vmatpush3.bf16.msra.mxu0 %v4415_v16  ;;  %v4417_v24 = vld [vmem:[#allocation7 + $0xe0] sm:$0xff]   ;;  %v5366_v51 = vpop.f32.mrb[67].mxu1 }
 0x1f0   : > { %4052 = vmatprep.subr.bf16.mxu0 %v4416_v42  ;;  %v5368_v58 = vpop.f32.mrb[68].mxu1  ;;  %4095 = vmatmul.mubr.msk.bf16.gmra.mrb[88].mxu1 %vm464_vm1, %v4969_v53  ;;  %v2056_v25 = vadd.f32 %v5426_v52, %v5366_v51 }
 0x1f1   : > { %4111 = vmatpush3.bf16.msra.mxu1 %v4429_v11  ;;  %4098 = vmatprep.mubr.msk.bf16.mxu1 %vm464_vm1, %v4986_v63  ;;  %v2077_v8 = vadd.f32 %v5426_v52, %v5368_v58 }
 0x1f2   : > { %v2116_v13 = vmul.f32 0.01, %v2056_v25 }
 0x1f3   : > { %4053 = vmatpush3.bf16.msra.mxu0 %v4416_v42  ;;  %v2121_v46 = vmul.f32 0.01, %v2077_v8 }
 0x1f4   : > { %4054 = vmatprep.subr.bf16.mxu0 %v4417_v24  ;;  %v2132_v49 = vmax.f32 %v2056_v25, %v2116_v13 }
 0x1f6   : > { %4039 = vmatmul.mubr.msk.bf16.gmra.mrb[56].mxu0 %vm464_vm1, %v5011_v34  ;;  %v4418_v34 = vld [vmem:[#allocation7 + $0xe8] sm:$0xff]  }
 0x1f7   : > { %4042 = vmatprep.mubr.msk.bf16.mxu0 %vm464_vm1, %v5013_v37  ;;  %4055 = vmatpush3.bf16.msra.mxu0 %v4417_v24  ;;  %v5370_v37 = vpop.f32.mrb[69].mxu1 }
 0x1f8   : > { %4056 = vmatprep.subr.bf16.mxu0 %v4418_v34  ;;  %4099 = vmatmul.mubr.msk.bf16.gmra.mrb[92].mxu1 %vm464_vm1, %v4989_v0  ;;  %v2064_v0 = vadd.f32 %v5426_v52, %v5364_v5  ;;  %v2069_v3 = vadd.f32 %v5426_v52, %v5370_v37 }
 0x1fa   : > { %v2118_v48 = vmul.f32 0.01, %v2064_v0  ;;  %v2119_v5 = vmul.f32 0.01, %v2069_v3 }
 0x1fb   : > { %4057 = vmatpush3.bf16.msra.mxu0 %v4418_v34 }
 0x1fc   : > { %4058 = vmatprep.subr.bf16.mxu0 %v4419_v39  ;;  %v2134_v7 = vmax.f32 %v2064_v0, %v2118_v48 }
 0x1fe   : > { %4043 = vmatmul.mubr.msk.bf16.gmra.mrb[60].mxu0 %vm464_vm1, %v5023_v41  ;;  %v5372_v41 = vpop.f32.mrb[70].mxu1 }
 0x1ff   : > { %v5374_v23 = vpop.f32.mrb[71].mxu1  ;;  %4059 = vmatpush3.bf16.msra.mxu0 %v4419_v39  ;;  %v2080_v14 = vadd.f32 %v5426_v52, %v5372_v41  ;;  %v2137_v41 = vmax.f32 %v2077_v8, %v2121_v46 }
 0x200   : > { %v5376_v9 = vpop.f32.mrb[72].mxu1  ;;  %4060 = vmatprep.subr.bf16.mxu0 %v4420_v40  ;;  %v2072_v57 = vadd.f32 %v5426_v52, %v5374_v23  ;;  %v2135_v23 = vmax.f32 %v2069_v3, %v2119_v5 }
 0x201   : > { %v5378_v2 = vpop.f32.mrb[73].mxu1  ;;  %v2122_v51 = vmul.f32 0.01, %v2080_v14 }
 0x202   : > { %v5380_v22 = vpop.f32.mrb[74].mxu1  ;;  %v2120_v58 = vmul.f32 0.01, %v2072_v57  ;;  %v2085_v55 = vadd.f32 %v5426_v52, %v5378_v2 }
 0x203   : > { %4061 = vmatpush3.bf16.msra.mxu0 %v4420_v40  ;;  %v5382_v32 = vpop.f32.mrb[75].mxu1  ;;  %v2093_v40 = vadd.f32 %v5426_v52, %v5376_v9  ;;  %v2138_v33 = vmax.f32 %v2080_v14, %v2122_v51  ;;  %v2096_v61 = vadd.f32 %v5426_v52, %v5380_v22 }
 0x204   : > { %v5384_v10 = vpop.f32.mrb[76].mxu1  ;;  %v2136_v11 = vmax.f32 %v2072_v57, %v2120_v58  ;;  %v2123_v62 = vmul.f32 0.01, %v2085_v55 }
 0x205   : > { %v5386_v35 = vpop.f32.mrb[77].mxu1  ;;  %v2125_v2 = vmul.f32 0.01, %v2093_v40 }
 0x206   : > { %v5388_v30 = vpop.f32.mrb[78].mxu1 }
 0x207   : > { %v5390_v38 = vpop.f32.mrb[79].mxu1  ;;  %v2141_v48 = vmax.f32 %v2093_v40, %v2125_v2  ;;  %v2112_v3 = vadd.f32 %v5426_v52, %v5388_v30 }
 0x2b9   : > { %v4032_v15 = vpop.f32.mrb[48].mxu0 }
 0x2ba   : > { %4553 = vtanh.f32 %v4032_v15  ;;  %v2215_v21 = vpop.f32.mrb[49].mxu0  ;;  %v2088_v15 = vadd.f32 %v5426_v52, %v5382_v32  ;;  %v2139_v32 = vmax.f32 %v2085_v55, %v2123_v62  ;;  %v4433_v55 = vld [vmem:[%s5652_s4 + $0x4] ss:$12 sps:$4 sm:$0xff]  }
 0x2bb   : > { %4555 = vtanh.f32 %v2215_v21  ;;  %v4033_v53 = vpop.f32.mrb[50].mxu0  ;;  %4134 = vmatprep.subr.bf16.mxu0 %v4433_v55 }
 0x2bc   : > { %4557 = vtanh.f32 %v4033_v53  ;;  %v2218_v63 = vpop.f32.mrb[51].mxu0  ;;  %v2124_v6 = vmul.f32 0.01, %v2088_v15 }
 0x2bd   : > { %4559 = vtanh.f32 %v2218_v63  ;;  %v2126_v63 = vmul.f32 0.01, %v2096_v61 }
 0x2c1   : > { %v4036_v29 = vpop.f32.mrb[52].mxu0 }
 0x2c2   : > { %4561 = vtanh.f32 %v4036_v29  ;;  %v2231_v27 = vpop.f32.mrb[53].mxu0  ;;  %v2109_v29 = vadd.f32 %v5426_v52, %v5384_v10 }
 0x2c3   : > { %4563 = vtanh.f32 %v2231_v27  ;;  %v4037_v4 = vpop.f32.mrb[54].mxu0 }
 0x2c4   : > { %v4554_v56 = vpop.eup %4553  ;;  %4565 = vtanh.f32 %v4037_v4  ;;  %v2234_v31 = vpop.f32.mrb[55].mxu0 }
 0x2c5   : > { %v4556_v28 = vpop.eup %4555  ;;  %v2296_v12 = vmul.f32 %v4554_v56, %v2133_v45  ;;  %4567 = vtanh.f32 %v2234_v31  ;;  %v2101_v45 = vadd.f32 %v5426_v52, %v5386_v35  ;;  %v2129_v35 = vmul.f32 0.01, %v2109_v29 }
 0x2c6   : > { %v4558_v59 = vpop.eup %4557  ;;  %v2294_v60 = vmul.f32 %v4556_v28, %v2131_v44  ;;  %v2142_v44 = vmax.f32 %v2096_v61, %v2126_v63  ;;  %v2140_v28 = vmax.f32 %v2088_v15, %v2124_v6  ;;  %v4438_v61 = vld [vmem:[%s5652_s4 + $0x7c] ss:$12 sps:$4 sm:$0xff]  }
 0x2c7   : > { %v4560_v16 = vpop.eup %4559  ;;  %v2297_v42 = vmul.f32 %v4558_v59, %v2134_v7  ;;  %v2145_v46 = vmax.f32 %v2109_v29, %v2129_v35 }
 0x2c8   : > { %v2295_v54 = vmul.f32 %v4560_v16, %v2132_v49  ;;  %v2130_v49 = vmul.f32 0.01, %v2112_v3 }
 0x2c9   : > { %v2311_v24 = vpack.c.bf16 %v2297_v42, %v2296_v12  ;;  %v4040_v34 = vpop.f32.mrb[56].mxu0  ;;  %v2104_v12 = vadd.f32 %v5426_v52, %v5390_v38 }
 0x2ca   : > { %4569 = vtanh.f32 %v4040_v34  ;;  %v2247_v37 = vpop.f32.mrb[57].mxu0  ;;  %v2310_v39 = vpack.c.bf16 %v2295_v54, %v2294_v60  ;;  %v2127_v60 = vmul.f32 0.01, %v2101_v45  ;;  %v2146_v51 = vmax.f32 %v2112_v3, %v2130_v49 }
 0x2cb   : > { %4571 = vtanh.f32 %v2247_v37  ;;  %v4041_v47 = vpop.f32.mrb[58].mxu0  ;;  %v2128_v16 = vmul.f32 0.01, %v2104_v12 }
 0x2cc   : > { %v4562_v50 = vpop.eup %4561  ;;  %4573 = vtanh.f32 %v4041_v47  ;;  %v2250_v1 = vpop.f32.mrb[59].mxu0  ;;  %4062 = vmatprep.mubr.bf16.mxu0 %v2310_v39  ;;  %v2143_v30 = vmax.f32 %v2101_v45, %v2127_v60  ;;  %v4430_v47 = vld [vmem:[%s5652_s4 + $0x78] ss:$12 sps:$4 sm:$0xff]  }
 0x2cd   : > { %v4564_v19 = vpop.eup %4563  ;;  %v2300_v18 = vmul.f32 %v4562_v50, %v2137_v41  ;;  %4575 = vtanh.f32 %v2250_v1  ;;  %4063 = vmatmul.mubr.bf16.vlgmr.msra.gmra.mrb[32].mxu0 %v2311_v24  ;;  %v2144_v38 = vmax.f32 %v2104_v12, %v2128_v16  ;;  %4112 = vmatprep.subr.bf16.mxu1 %v4430_v47  ;;  %v4431_v50 = vld [vmem:[%s5652_s4 + $0x90] ss:$12 sps:$4 sm:$0xff]  }
 0x2ce   : > { %v4566_v26 = vpop.eup %4565  ;;  %v2298_v9 = vmul.f32 %v4564_v19, %v2135_v23  ;;  %4113 = vmatpush3.bf16.msra.mxu1 %v4430_v47  ;;  %v4432_v23 = vld [vmem:[%s5652_s4 + $0xa8] ss:$12 sps:$4 sm:$0xff]   ;;  %4135 = vmatpush3.bf16.msra.mxu0 %v4433_v55 }
 0x2cf   : > { %v4568_v21 = vpop.eup %4567  ;;  %v2301_v20 = vmul.f32 %v4566_v26, %v2138_v33  ;;  %4114 = vmatprep.subr.bf16.mxu1 %v4431_v50  ;;  %v4434_v1 = vld [vmem:[%s5652_s4 + $0x1c] ss:$12 sps:$4 sm:$0xff]   ;;  %v4435_v19 = vld [vmem:[%s5652_s4 + $0x34] ss:$12 sps:$4 sm:$0xff]   ;;  %v4437_v33 = vld [vmem:[%s5652_s4 + $0x64] ss:$12 sps:$4 sm:$0xff]  }
 0x2d0   : > { %v2299_v53 = vmul.f32 %v4568_v21, %v2136_v11  ;;  %4136 = vmatprep.subr.bf16.mxu0 %v4434_v1  ;;  %v5490_v26 = vld [vmem:[%s5653_s5 + $0x1] ss:$0 sm:$0xff] }
 0x2d1   : > { %v4044_v0 = vpop.f32.mrb[60].mxu0  ;;  %v2313_v25 = vpack.c.bf16 %v2301_v20, %v2300_v18  ;;  %v4436_v18 = vld [vmem:[%s5652_s4 + $0x4c] ss:$12 sps:$4 sm:$0xff]  }
 0x2d2   : > { %4577 = vtanh.f32 %v4044_v0  ;;  %v2263_v17 = vpop.f32.mrb[61].mxu0  ;;  %v2312_v22 = vpack.c.bf16 %v2299_v53, %v2298_v9  ;;  %4115 = vmatpush3.bf16.msra.mxu1 %v4431_v50  ;;  %4137 = vmatpush3.bf16.msra.mxu0 %v4434_v1 }
 0x2d3   : > { %4579 = vtanh.f32 %v2263_v17  ;;  %v4045_v13 = vpop.f32.mrb[62].mxu0  ;;  %4116 = vmatprep.subr.bf16.mxu1 %v4432_v23  ;;  %4138 = vmatprep.subr.bf16.mxu0 %v4435_v19 }
 0x2d4   : > { %v4570_v27 = vpop.eup %4569  ;;  %4581 = vtanh.f32 %v4045_v13  ;;  %v2266_v8 = vpop.f32.mrb[63].mxu0  ;;  %4066 = vmatprep.mubr.bf16.mxu0 %v2312_v22 }
 0x2d5   : > { %v4572_v4 = vpop.eup %4571  ;;  %v2304_v56 = vmul.f32 %v4570_v27, %v2141_v48  ;;  %4583 = vtanh.f32 %v2266_v8  ;;  %4067 = vmatmul.mubr.bf16.gmra.mrb[36].mxu0 %v2313_v25 }
 0x2d6   : > { %v4574_v31 = vpop.eup %4573  ;;  %v2302_v10 = vmul.f32 %v4572_v4, %v2139_v32  ;;  %4117 = vmatpush3.bf16.msra.mxu1 %v4432_v23  ;;  %4139 = vmatpush3.bf16.msra.mxu0 %v4435_v19 }
 0x2d7   : > { %v4576_v7 = vpop.eup %4575  ;;  %v2305_v14 = vmul.f32 %v4574_v31, %v2142_v44  ;;  %4140 = vmatprep.subr.bf16.mxu0 %v4436_v18 }
 0x2d8   : > { %v2303_v59 = vmul.f32 %v4576_v7, %v2140_v28 }
 0x2d9   : > { %v2315_v57 = vpack.c.bf16 %v2305_v14, %v2304_v56 }
 0x2da   : > { %v2314_v42 = vpack.c.bf16 %v2303_v59, %v2302_v10  ;;  %4141 = vmatpush3.bf16.msra.mxu0 %v4436_v18 }
 0x2db   : > { %4142 = vmatprep.subr.bf16.mxu0 %v4437_v33 }
 0x2dc   : > { %v4578_v54 = vpop.eup %4577  ;;  %4070 = vmatprep.mubr.bf16.mxu0 %v2314_v42 }
 0x2dd   : > { %v4580_v5 = vpop.eup %4579  ;;  %v2308_v24 = vmul.f32 %v4578_v54, %v2145_v46  ;;  %4071 = vmatmul.mubr.bf16.gmra.mrb[40].mxu0 %v2315_v57 }
 0x2de   : > { %v4582_v34 = vpop.eup %4581  ;;  %v2306_v58 = vmul.f32 %v4580_v5, %v2143_v30  ;;  %4143 = vmatpush3.bf16.msra.mxu0 %v4437_v33 }
 0x2df   : > { %v4584_v52 = vpop.eup %4583  ;;  %v2309_v37 = vmul.f32 %v4582_v34, %v2146_v51  ;;  %4144 = vmatprep.subr.bf16.mxu0 %v4438_v61 }
 0x2e0   : > { %v2307_v39 = vmul.f32 %v4584_v52, %v2144_v38 }
 0x2e1   : > { %v2317_v41 = vpack.c.bf16 %v2309_v37, %v2308_v24 }
 0x2e2   : > { %v2316_v40 = vpack.c.bf16 %v2307_v39, %v2306_v58  ;;  %4145 = vmatpush3.bf16.msra.mxu0 %v4438_v61 }
 0x2e4   : > { %4074 = vmatprep.mubr.bf16.mxu0 %v2316_v40 }
 0x2e5   : > { %4075 = vmatmul.mubr.bf16.gmra.mrb[44].mxu0 %v2317_v41 }
 0x3a0   : > { %v4064_v9 = vpop.f32.mrb[32].mxu0 }
 0x3a1   : > { %v2632_v11 = vadd.f32 %v4064_v9, %v5490_v26  ;;  %v2416_v15 = vpop.f32.mrb[33].mxu0 }
 0x3a2   : > { %v2630_v21 = vadd.f32 %v5490_v26, %v2416_v15  ;;  %v4065_v20 = vpop.f32.mrb[34].mxu0 }
 0x3a3   : > { %v2648_v2 = vmul.f32 0.01, %v2632_v11  ;;  %v2633_v53 = vadd.f32 %v4065_v20, %v5490_v26  ;;  %v2419_v62 = vpop.f32.mrb[35].mxu0 }
 0x3a4   : > { %v2646_v63 = vmul.f32 0.01, %v2630_v21  ;;  %v2631_v0 = vadd.f32 %v5490_v26, %v2419_v62 }
 0x3a5   : > { %v2649_v25 = vmul.f32 0.01, %v2633_v53  ;;  %v2664_v17 = vmax.f32 %v2632_v11, %v2648_v2 }
 0x3a6   : > { %v2647_v6 = vmul.f32 0.01, %v2631_v0  ;;  %v2662_v48 = vmax.f32 %v2630_v21, %v2646_v63 }
 0x3a7   : > { %v2665_v22 = vmax.f32 %v2633_v53, %v2649_v25 }
 0x3a8   : > { %v2663_v29 = vmax.f32 %v2631_v0, %v2647_v6  ;;  %v4068_v13 = vpop.f32.mrb[36].mxu0  ;;  %v4439_v6 = vld [vmem:[%s5652_s4 + $0x94] ss:$12 sps:$4 sm:$0xff]  }
 0x3a9   : > { %v2679_v27 = vpack.c.bf16 %v2665_v22, %v2664_v17  ;;  %v2636_v32 = vadd.f32 %v4068_v13, %v5490_v26  ;;  %v2432_v45 = vpop.f32.mrb[37].mxu0  ;;  %4146 = vmatprep.subr.bf16.mxu0 %v4439_v6  ;;  %v4441_v17 = vld [vmem:[%s5652_s4 + $0x8] ss:$12 sps:$4 sm:$0xff]   ;;  %v4442_v22 = vld [vmem:[%s5652_s4 + $0x20] ss:$12 sps:$4 sm:$0xff]  }
 0x3aa   : > { %v2634_v8 = vadd.f32 %v5490_v26, %v2432_v45  ;;  %v4069_v4 = vpop.f32.mrb[38].mxu0  ;;  %v2678_v56 = vpack.c.bf16 %v2663_v29, %v2662_v48  ;;  %4147 = vmatpush3.bf16.msra.mxu0 %v4439_v6  ;;  %4166 = vmatprep.subr.bf16.mxu1 %v4441_v17  ;;  %v4443_v48 = vld [vmem:[%s5652_s4 + $0x38] ss:$12 sps:$4 sm:$0xff]   ;;  %v4444_v29 = vld [vmem:[%s5652_s4 + $0x50] ss:$12 sps:$4 sm:$0xff]  }
 0x3ab   : > { %v2652_v44 = vmul.f32 0.01, %v2636_v32  ;;  %v2637_v3 = vadd.f32 %v4069_v4, %v5490_v26  ;;  %v2435_v31 = vpop.f32.mrb[39].mxu0  ;;  %v4445_v13 = vld [vmem:[%s5652_s4 + $0x68] ss:$12 sps:$4 sm:$0xff]  }
 0x3ac   : > { %v2650_v10 = vmul.f32 0.01, %v2634_v8  ;;  %v2635_v28 = vadd.f32 %v5490_v26, %v2435_v31  ;;  %4118 = vmatprep.mubr.bf16.mxu1 %v2678_v56  ;;  %v5708_v31 = vld [vmem:[#allocation14_spill] sm:$0xff]  ;;  %v5557_v6 = vld [vmem:[%s5653_s5 + $0x2] ss:$0 sm:$0xff] }
 0x3ad   : > { %v2653_v12 = vmul.f32 0.01, %v2637_v3  ;;  %4119 = vmatmul.mubr.bf16.vlgmr.msra.gmra.mrb[96].mxu1 %v2679_v27  ;;  %v2668_v14 = vmax.f32 %v2636_v32, %v2652_v44  ;;  %v5707_v44 = vld [vmem:[#allocation13_spill] sm:$0xff] }
 0x3ae   : > { %v2651_v7 = vmul.f32 0.01, %v2635_v28  ;;  %v2666_v59 = vmax.f32 %v2634_v8, %v2650_v10  ;;  %4167 = vmatpush3.bf16.msra.mxu1 %v4441_v17 }
 0x3af   : > { %v2669_v35 = vmax.f32 %v2637_v3, %v2653_v12  ;;  %4168 = vmatprep.subr.bf16.mxu1 %v4442_v22 }
 0x3b0   : > { %v2667_v60 = vmax.f32 %v2635_v28, %v2651_v7  ;;  %v4072_v49 = vpop.f32.mrb[40].mxu0 }
 0x3b1   : > { %v2640_v57 = vadd.f32 %v4072_v49, %v5490_v26  ;;  %v2448_v16 = vpop.f32.mrb[41].mxu0  ;;  %v2681_v42 = vpack.c.bf16 %v2669_v35, %v2668_v14  ;;  %v5710_v49 = vld [vmem:[#allocation16_spill] sm:$0xff] }
 0x3b2   : > { %v2638_v46 = vadd.f32 %v5490_v26, %v2448_v16  ;;  %v4073_v54 = vpop.f32.mrb[42].mxu0  ;;  %v2680_v30 = vpack.c.bf16 %v2667_v60, %v2666_v59  ;;  %4169 = vmatpush3.bf16.msra.mxu1 %v4442_v22  ;;  %v5709_v59 = vld [vmem:[#allocation15_spill] sm:$0xff] }
 0x3b3   : > { %v2656_v5 = vmul.f32 0.01, %v2640_v57  ;;  %v2641_v24 = vadd.f32 %v4073_v54, %v5490_v26  ;;  %v2451_v51 = vpop.f32.mrb[43].mxu0  ;;  %4170 = vmatprep.subr.bf16.mxu1 %v4443_v48 }
 0x3b4   : > { %v2654_v34 = vmul.f32 0.01, %v2638_v46  ;;  %v2639_v58 = vadd.f32 %v5490_v26, %v2451_v51  ;;  %4122 = vmatprep.mubr.bf16.mxu1 %v2680_v30 }
 0x3b5   : > { %v2657_v38 = vmul.f32 0.01, %v2641_v24  ;;  %4123 = vmatmul.mubr.bf16.gmra.mrb[100].mxu1 %v2681_v42  ;;  %v2672_v37 = vmax.f32 %v2640_v57, %v2656_v5 }
 0x3b6   : > { %v2655_v52 = vmul.f32 0.01, %v2639_v58  ;;  %v2670_v41 = vmax.f32 %v2638_v46, %v2654_v34  ;;  %4171 = vmatpush3.bf16.msra.mxu1 %v4443_v48  ;;  %v5713_v34 = vld [vmem:[#allocation19_spill] sm:$0xff] }
 0x3b7   : > { %v2673_v39 = vmax.f32 %v2641_v24, %v2657_v38  ;;  %4172 = vmatprep.subr.bf16.mxu1 %v4444_v29  ;;  %v5714_v38 = vld [vmem:[#allocation20_spill] sm:$0xff] }
 0x3b8   : > { %v2671_v40 = vmax.f32 %v2639_v58, %v2655_v52  ;;  %v4076_v47 = vpop.f32.mrb[44].mxu0 }
 0x3b9   : > { %v2644_v50 = vadd.f32 %v4076_v47, %v5490_v26  ;;  %v2464_v23 = vpop.f32.mrb[45].mxu0  ;;  %v2683_v55 = vpack.c.bf16 %v2673_v39, %v2672_v37  ;;  %v5715_v39 = vld [vmem:[#allocation21_spill] sm:$0xff] }
 0x3ba   : > { %v2642_v1 = vadd.f32 %v5490_v26, %v2464_v23  ;;  %v4077_v19 = vpop.f32.mrb[46].mxu0  ;;  %v2682_v18 = vpack.c.bf16 %v2671_v40, %v2670_v41  ;;  %4173 = vmatpush3.bf16.msra.mxu1 %v4444_v29  ;;  %v5716_v40 = vld [vmem:[#allocation22_spill] sm:$0xff] }
 0x3bb   : > { %v2660_v33 = vmul.f32 0.01, %v2644_v50  ;;  %v2645_v61 = vadd.f32 %v4077_v19, %v5490_v26  ;;  %v2467_v9 = vpop.f32.mrb[47].mxu0  ;;  %4174 = vmatprep.subr.bf16.mxu1 %v4445_v13 }
 0x3bc   : > { %v2658_v11 = vmul.f32 0.01, %v2642_v1  ;;  %v2643_v15 = vadd.f32 %v5490_v26, %v2467_v9  ;;  %4126 = vmatprep.mubr.bf16.mxu1 %v2682_v18  ;;  %v4440_v26 = vld [vmem:[%s5652_s4 + $0xac] ss:$12 sps:$4 sm:$0xff]   ;;  %v5717_v18 = vld [vmem:[#allocation23_spill] sm:$0xff] }
 0x3bd   : > { %v2661_v21 = vmul.f32 0.01, %v2645_v61  ;;  %4127 = vmatmul.mubr.bf16.gmra.mrb[104].mxu1 %v2683_v55  ;;  %v2676_v2 = vmax.f32 %v2644_v50, %v2660_v33  ;;  %4148 = vmatprep.subr.bf16.mxu0 %v4440_v26 }
 0x3be   : > { %v2659_v20 = vmul.f32 0.01, %v2643_v15  ;;  %v2674_v62 = vmax.f32 %v2642_v1, %v2658_v11  ;;  %4149 = vmatpush3.bf16.msra.mxu0 %v4440_v26  ;;  %4175 = vmatpush3.bf16.msra.mxu1 %v4445_v13 }
 0x3bf   : > { %v2677_v53 = vmax.f32 %v2645_v61, %v2661_v21  ;;  %v5718_v61 = vld [vmem:[#allocation24_spill] sm:$0xff] }
 0x3c0   : > { %v2675_v63 = vmax.f32 %v2643_v15, %v2659_v20  ;;  %v5719_v15 = vld [vmem:[#allocation25_spill] sm:$0xff]  ;;  %v5720_v20 = vld [vmem:[#allocation26_spill] sm:$0xff] }
 0x3c1   : > { %v2685_v0 = vpack.c.bf16 %v2677_v53, %v2676_v2 }
 0x3c2   : > { %v2684_v25 = vpack.c.bf16 %v2675_v63, %v2674_v62  ;;  %v4446_v63 = vld [vmem:[%s5652_s4 + $0x80] ss:$12 sps:$4 sm:$0xff]  }
 0x3c3   : > { %4176 = vmatprep.subr.bf16.mxu1 %v4446_v63 }
 0x3c4   : > { %4130 = vmatprep.mubr.bf16.mxu1 %v2684_v25  ;;  %4177 = vmatpush3.bf16.msra.mxu1 %v4446_v63  ;;  %v4448_v25 = vld [vmem:[%s5652_s4 + $0xb0] ss:$12 sps:$4 sm:$0xff]  }
 0x3c5   : > { %4131 = vmatmul.mubr.bf16.gmra.mrb[108].mxu1 %v2685_v0  ;;  %v4447_v0 = vld [vmem:[%s5652_s4 + $0x98] ss:$12 sps:$4 sm:$0xff]  }
 0x3c6   : > { %4178 = vmatprep.subr.bf16.mxu1 %v4447_v0 }
 0x3c8   : > { %4179 = vmatpush3.bf16.msra.mxu1 %v4447_v0 }
 0x3c9   : > { %4180 = vmatprep.subr.bf16.mxu1 %v4448_v25 }
 0x3cc   : > { %4181 = vmatpush3.bf16.msra.mxu1 %v4448_v25 }
 0x480   : > { %v4120_v27 = vpop.f32.mrb[96].mxu1 }
 0x481   : > { %v2784_v32 = vpop.f32.mrb[97].mxu1  ;;  %v2793_v8 = vadd.f32 %v4120_v27, %v5111_v36  ;;  %v5711_v36 = vld [vmem:[#allocation17_spill] sm:$0xff] }
 0x482   : > { %v4121_v45 = vpop.f32.mrb[98].mxu1  ;;  %v2785_v3 = vadd.f32 %v2784_v32, %v5707_v44 }
 0x483   : > { %v2796_v4 = vadd.f32 %v4121_v45, %v5113_v43  ;;  %v2787_v56 = vpop.f32.mrb[99].mxu1  ;;  %v5712_v43 = vld [vmem:[#allocation18_spill] sm:$0xff] }
 0x484   : > { %v2788_v10 = vadd.f32 %v2787_v56, %v5708_v31 }
 0x485   : > { %v2848_v28 = vpack.c.bf16 %v2796_v4, %v2793_v8 }
 0x486   : > { %v2847_v12 = vpack.c.bf16 %v2788_v10, %v2785_v3 }
 0x488   : > { %v4124_v7 = vpop.f32.mrb[100].mxu1  ;;  %4150 = vmatprep.mubr.bf16.mxu0 %v2847_v12 }
 0x489   : > { %v2800_v14 = vpop.f32.mrb[101].mxu1  ;;  %4151 = vmatmul.mubr.bf16.vlgmr.msra.gmra.mrb[64].mxu0 %v2848_v28  ;;  %v2809_v60 = vadd.f32 %v4124_v7, %v5709_v59 }
 0x48a   : > { %v4125_v35 = vpop.f32.mrb[102].mxu1  ;;  %v2801_v42 = vadd.f32 %v2800_v14, %v5711_v36 }
 0x48b   : > { %v2812_v57 = vadd.f32 %v4125_v35, %v5710_v49  ;;  %v2803_v16 = vpop.f32.mrb[103].mxu1 }
 0x48c   : > { %v2804_v46 = vadd.f32 %v2803_v16, %v5712_v43 }
 0x48d   : > { %v2850_v54 = vpack.c.bf16 %v2812_v57, %v2809_v60 }
 0x48e   : > { %v2849_v30 = vpack.c.bf16 %v2804_v46, %v2801_v42 }
 0x490   : > { %v4128_v5 = vpop.f32.mrb[104].mxu1  ;;  %4154 = vmatprep.mubr.bf16.mxu0 %v2849_v30 }
 0x491   : > { %v2816_v24 = vpop.f32.mrb[105].mxu1  ;;  %4155 = vmatmul.mubr.bf16.gmra.mrb[68].mxu0 %v2850_v54  ;;  %v2825_v58 = vadd.f32 %v4128_v5, %v5713_v34 }
 0x492   : > { %v4129_v51 = vpop.f32.mrb[106].mxu1  ;;  %v2817_v41 = vadd.f32 %v2816_v24, %v5715_v39 }
 0x493   : > { %v2828_v52 = vadd.f32 %v4129_v51, %v5714_v38  ;;  %v2819_v37 = vpop.f32.mrb[107].mxu1 }
 0x494   : > { %v2820_v47 = vadd.f32 %v2819_v37, %v5716_v40 }
 0x495   : > { %v2852_v50 = vpack.c.bf16 %v2828_v52, %v2825_v58 }
 0x496   : > { %v2851_v23 = vpack.c.bf16 %v2820_v47, %v2817_v41 }
 0x498   : > { %v4132_v55 = vpop.f32.mrb[108].mxu1  ;;  %4158 = vmatprep.mubr.bf16.mxu0 %v2851_v23 }
 0x499   : > { %v2832_v1 = vpop.f32.mrb[109].mxu1  ;;  %4159 = vmatmul.mubr.bf16.gmra.mrb[72].mxu0 %v2852_v50  ;;  %v2841_v33 = vadd.f32 %v4132_v55, %v5717_v18 }
 0x49a   : > { %v4133_v19 = vpop.f32.mrb[110].mxu1  ;;  %v2833_v21 = vadd.f32 %v2832_v1, %v5719_v15 }
 0x49b   : > { %v2844_v9 = vadd.f32 %v4133_v19, %v5718_v61  ;;  %v2835_v11 = vpop.f32.mrb[111].mxu1 }
 0x49c   : > { %v2836_v2 = vadd.f32 %v2835_v11, %v5720_v20 }
 0x49d   : > { %v2854_v53 = vpack.c.bf16 %v2844_v9, %v2841_v33 }
 0x49e   : > { %v2853_v62 = vpack.c.bf16 %v2836_v2, %v2833_v21 }
 0x4a0   : > { %4162 = vmatprep.mubr.bf16.mxu0 %v2853_v62 }
 0x4a1   : > { %4163 = vmatmul.mubr.bf16.gmra.mrb[76].mxu0 %v2854_v53 }
 0x55c   : > { %v4152_v26 = vpop.f32.mrb[64].mxu0 }
 0x55d   : > { %v2966_v17 = vadd.f32 %v4152_v26, %v5557_v6  ;;  %v2957_v22 = vpop.f32.mrb[65].mxu0 }
 0x55e   : > { %v2958_v48 = vadd.f32 %v5557_v6, %v2957_v22  ;;  %v4153_v29 = vpop.f32.mrb[66].mxu0 }
 0x55f   : > { %v3022_v13 = vmul.f32 0.01, %v2966_v17  ;;  %v2969_v27 = vadd.f32 %v4153_v29, %v5557_v6  ;;  %v2960_v32 = vpop.f32.mrb[67].mxu0 }
 0x560   : > { %v3020_v45 = vmul.f32 0.01, %v2958_v48  ;;  %v2961_v8 = vadd.f32 %v5557_v6, %v2960_v32 }
 0x561   : > { %v3023_v4 = vmul.f32 0.01, %v2969_v27  ;;  %v3038_v44 = vmax.f32 %v2966_v17, %v3022_v13 }
 0x562   : > { %v3021_v56 = vmul.f32 0.01, %v2961_v8  ;;  %v3036_v31 = vmax.f32 %v2958_v48, %v3020_v45 }
 0x563   : > { %v3039_v3 = vmax.f32 %v2969_v27, %v3023_v4 }
 0x564   : > { %v3037_v10 = vmax.f32 %v2961_v8, %v3021_v56  ;;  %v4156_v28 = vpop.f32.mrb[68].mxu0 }
 0x565   : > { %v3053_v12 = vpack.c.bf16 %v3039_v3, %v3038_v44  ;;  %v2982_v7 = vadd.f32 %v4156_v28, %v5557_v6  ;;  %v2973_v14 = vpop.f32.mrb[69].mxu0 }
 0x566   : > { %v2974_v35 = vadd.f32 %v5557_v6, %v2973_v14  ;;  %v4157_v59 = vpop.f32.mrb[70].mxu0  ;;  %v3052_v60 = vpack.c.bf16 %v3037_v10, %v3036_v31 }
 0x567   : > { %v3026_v49 = vmul.f32 0.01, %v2982_v7  ;;  %v2985_v57 = vadd.f32 %v4157_v59, %v5557_v6  ;;  %v2976_v16 = vpop.f32.mrb[71].mxu0 }
 0x568   : > { %v3024_v36 = vmul.f32 0.01, %v2974_v35  ;;  %v2977_v42 = vadd.f32 %v5557_v6, %v2976_v16  ;;  %4182 = vmatprep.mubr.bf16.mxu1 %v3052_v60 }
 0x569   : > { %v3027_v43 = vmul.f32 0.01, %v2985_v57  ;;  %4183 = vmatmul.mubr.bf16.vlgmr.msra.gmra.mrb[80].mxu1 %v3053_v12  ;;  %v3042_v54 = vmax.f32 %v2982_v7, %v3026_v49 }
 0x56a   : > { %v3025_v46 = vmul.f32 0.01, %v2977_v42  ;;  %v3040_v5 = vmax.f32 %v2974_v35, %v3024_v36 }
 0x56b   : > { %v3043_v30 = vmax.f32 %v2985_v57, %v3027_v43 }
 0x56c   : > { %v3041_v24 = vmax.f32 %v2977_v42, %v3025_v46  ;;  %v4160_v51 = vpop.f32.mrb[72].mxu0 }
 0x56d   : > { %v2998_v34 = vadd.f32 %v4160_v51, %v5557_v6  ;;  %v2989_v58 = vpop.f32.mrb[73].mxu0  ;;  %v3055_v38 = vpack.c.bf16 %v3043_v30, %v3042_v54 }
 0x56e   : > { %v2990_v52 = vadd.f32 %v5557_v6, %v2989_v58  ;;  %v4161_v37 = vpop.f32.mrb[74].mxu0  ;;  %v3054_v39 = vpack.c.bf16 %v3041_v24, %v3040_v5 }
 0x56f   : > { %v3030_v41 = vmul.f32 0.01, %v2998_v34  ;;  %v3001_v40 = vadd.f32 %v4161_v37, %v5557_v6  ;;  %v2992_v47 = vpop.f32.mrb[75].mxu0 }
 0x570   : > { %v3028_v50 = vmul.f32 0.01, %v2990_v52  ;;  %v2993_v23 = vadd.f32 %v5557_v6, %v2992_v47  ;;  %4186 = vmatprep.mubr.bf16.mxu1 %v3054_v39 }
 0x571   : > { %v3031_v55 = vmul.f32 0.01, %v3001_v40  ;;  %4187 = vmatmul.mubr.bf16.gmra.mrb[84].mxu1 %v3055_v38  ;;  %v3046_v19 = vmax.f32 %v2998_v34, %v3030_v41 }
 0x572   : > { %v3029_v1 = vmul.f32 0.01, %v2993_v23  ;;  %v3044_v33 = vmax.f32 %v2990_v52, %v3028_v50 }
 0x573   : > { %v3047_v18 = vmax.f32 %v3001_v40, %v3031_v55 }
 0x574   : > { %v3045_v61 = vmax.f32 %v2993_v23, %v3029_v1  ;;  %v4164_v9 = vpop.f32.mrb[76].mxu0 }
 0x575   : > { %v3014_v11 = vadd.f32 %v4164_v9, %v5557_v6  ;;  %v3005_v15 = vpop.f32.mrb[77].mxu0  ;;  %v3057_v21 = vpack.c.bf16 %v3047_v18, %v3046_v19 }
 0x576   : > { %v3006_v20 = vadd.f32 %v5557_v6, %v3005_v15  ;;  %v4165_v2 = vpop.f32.mrb[78].mxu0  ;;  %v3056_v53 = vpack.c.bf16 %v3045_v61, %v3044_v33 }
 0x577   : > { %v3034_v62 = vmul.f32 0.01, %v3014_v11  ;;  %v3017_v63 = vadd.f32 %v4165_v2, %v5557_v6  ;;  %v3008_v0 = vpop.f32.mrb[79].mxu0 }
 0x578   : > { %v3032_v25 = vmul.f32 0.01, %v3006_v20  ;;  %v3009_v26 = vadd.f32 %v5557_v6, %v3008_v0  ;;  %4190 = vmatprep.mubr.bf16.mxu1 %v3056_v53 }
 0x579   : > { %v3035_v17 = vmul.f32 0.01, %v3017_v63  ;;  %4191 = vmatmul.mubr.bf16.gmra.mrb[88].mxu1 %v3057_v21  ;;  %v3050_v48 = vmax.f32 %v3014_v11, %v3034_v62 }
 0x57a   : > { %v3033_v22 = vmul.f32 0.01, %v3009_v26  ;;  %v3048_v13 = vmax.f32 %v3006_v20, %v3032_v25 }
 0x57b   : > { %v3051_v29 = vmax.f32 %v3017_v63, %v3035_v17 }
 0x57c   : > { %v3049_v27 = vmax.f32 %v3009_v26, %v3033_v22 }
 0x57d   : > { %v3059_v32 = vpack.c.bf16 %v3051_v29, %v3050_v48 }
 0x57e   : > { %v3058_v45 = vpack.c.bf16 %v3049_v27, %v3048_v13 }
 0x580   : > { %4194 = vmatprep.mubr.bf16.mxu1 %v3058_v45 }
 0x581   : > { %4195 = vmatmul.mubr.bf16.gmra.mrb[92].mxu1 %v3059_v32 }
 0x63c   : > { %v4184_v8 = vpop.f32.mrb[80].mxu1 }
 0x63d   : > { %3223 = vst [vmem:[%s5578_s14 + $0x10] sm:$0xff] %v4184_v8  ;;  %v3158_v6 = vpop.f32.mrb[81].mxu1 }
 0x63e   : > { %3221 = vst [vmem:[%s5578_s14] sm:$0xff] %v3158_v6  ;;  %v4185_v4 = vpop.f32.mrb[82].mxu1 }
 0x63f   : > { %3224 = vst [vmem:[%s5578_s14 + $0x18] sm:$0xff] %v4185_v4  ;;  %v3161_v56 = vpop.f32.mrb[83].mxu1 }
 0x640   : > { %3222 = vst [vmem:[%s5578_s14 + $0x8] sm:$0xff] %v3161_v56 }
 0x644   : > { %v4188_v44 = vpop.f32.mrb[84].mxu1 }
 0x645   : > { %3227 = vst [vmem:[%s5578_s14 + $0x30] sm:$0xff] %v4188_v44  ;;  %v3174_v3 = vpop.f32.mrb[85].mxu1 }
 0x646   : > { %3225 = vst [vmem:[%s5578_s14 + $0x20] sm:$0xff] %v3174_v3  ;;  %v4189_v31 = vpop.f32.mrb[86].mxu1 }
 0x647   : > { %3228 = vst [vmem:[%s5578_s14 + $0x38] sm:$0xff] %v4189_v31  ;;  %v3177_v10 = vpop.f32.mrb[87].mxu1 }
 0x648   : > { %3226 = vst [vmem:[%s5578_s14 + $0x28] sm:$0xff] %v3177_v10 }
 0x64c   : > { %v4192_v28 = vpop.f32.mrb[88].mxu1 }
 0x64d   : > { %3231 = vst [vmem:[%s5578_s14 + $0x50] sm:$0xff] %v4192_v28  ;;  %v3190_v12 = vpop.f32.mrb[89].mxu1 }
 0x64e   : > { %3229 = vst [vmem:[%s5578_s14 + $0x40] sm:$0xff] %v3190_v12  ;;  %v4193_v7 = vpop.f32.mrb[90].mxu1 }
 0x64f   : > { %3232 = vst [vmem:[%s5578_s14 + $0x58] sm:$0xff] %v4193_v7  ;;  %v3193_v14 = vpop.f32.mrb[91].mxu1 }
 0x650   : > { %3230 = vst [vmem:[%s5578_s14 + $0x48] sm:$0xff] %v3193_v14 }
 0x654   : > { %v4196_v35 = vpop.f32.mrb[92].mxu1 }
 0x655   : > { %3235 = vst [vmem:[%s5578_s14 + $0x70] sm:$0xff] %v4196_v35  ;;  %v3206_v59 = vpop.f32.mrb[93].mxu1 }
 0x656   : > { %3233 = vst [vmem:[%s5578_s14 + $0x60] sm:$0xff] %v3206_v59  ;;  %v4197_v60 = vpop.f32.mrb[94].mxu1 }
 0x657   : > { %3236 = vst [vmem:[%s5578_s14 + $0x78] sm:$0xff] %v4197_v60  ;;  %v3209_v49 = vpop.f32.mrb[95].mxu1 }
 0x658   : > { %3234 = vst [vmem:[%s5578_s14 + $0x68] sm:$0xff] %v3209_v49 }
 0x659   : > { %4683 = shalt.err (!%p4680_p11)
}
 0x65a   : > { %s4684_s17 = scalar_lea.hbm %s5598_s12, 2048  ;;  %s4688_s26 = scalar_lea.hbm %s5654_s6, 4096 }
 0x65b   : > { %p4685_p13 = scmp.ne.s32.totalorder %s5598_s12, %s4684_s17  ;;  %p4689_p6 = scmp.lt.u32.totalorder %s5598_s12, %s5654_s6 }
 0x65c   : > { %p4690_p9 = scmp.lt.u32.totalorder %s4688_s26, %s4684_s17  ;;  %p4692_p12 = scmp.lt.u32.totalorder %s4684_s17, %s5598_s12 }
 0x65d   : > { %p4686_p5 = pnand %p4685_p13, %p5721_p1 }
 0x65e   : > { %p4691_p10 = por %p4690_p9, %p4689_p6 }
 0x65f   : > { %p4687_p0 = pneg %p4686_p5 }
 0x660   : > { %p4693_p2 = por %p4692_p12, %p4691_p10 }
 0x662   : > { %p4694_p3 = pnand %p4693_p2, %p4687_p0 }
 0x664   : > { %4697 = shalt.err (!%p4694_p3)
}
 0x665   : > { %s4752_s11 = smov 128   ;;  %s4753_s14 = smov 8  }
 0x666   : > { %4283 = dma.vmem_to_hbm [thread:$0]  (%p5721_p1), %s5600_s30, 2048, %s5598_s12, %s5607_s25, %s4752_s11, %s4752_s11, %s4753_s14  }
 0x667 PF: > { %p4305_p4 = scmp.ge.s32.totalorder %s4740_s24, 2  ;;  %s3266_s10 = sand.u32 1, %s4728_s21  }
 0x668   : > { %p5722_p7 = scmp.ne.s32.totalorder %s5675_s8, 0  ;;  %s3267_s13 = scalar_lea.sflag [#allocation4], %s3266_s10 }
 0x66a   : > { %p4296_p8 = pnand %p4305_p4, %p5722_p7 }
 0x66c   : > { %4723 = dma.done.wait (!%p4296_p8), %s3267_s13, 2048  }
 0x66d   : > { %4725 = vsyncadd (!%p4296_p8), %s3267_s13, 4294965248  ;;  %s5723_s2 = sld [smem:[#allocation12_spill]]  ;;  %p18_p11 = scmp.ge.s32.totalorder %s4814_s27, 4  }
 0x66e   : > { %s5724_s21 = smov %s4732_s22  ;;  %s5725_s22 = smov %s4736_s23 }
 0x66f   : > { %s5727_s24 = smov %s4814_s27  ;;  %20 = sbr.rel (!%p18_p11) target bundleno = 7 (0x7), region = 92 }
 0x673   : > { %s5726_s23 = smov %s5723_s2 }
 0x676   :  { %3272 = vsyncpa [#allocation3], 1 }
 0x677   :  { %3274 = vsyncpa [#allocation3 + $0x1], 1 }
 0x678   :  { %3275 = vsyncpa [#allocation6], 1 }
 0x679   :  { %3276 = vsyncpa [#allocation4], 1 }
 0x67a   :  { %3278 = vsyncpa [#allocation4 + $0x1], 1 }

</bundles_post_ra>
